<compile_context>
chip_gen: v6e
topology: v6e:2x2x1
jax: 0.10.0
libtpu: 0.0.40
codegen_flags: <defaults>
</compile_context>

<pallas_src>
import functools

import jax
import jax.numpy as jnp
from jax.experimental import pallas as pl
from jax.experimental.pallas import tpu as pltpu

LANE = 128          # MXU / lane width
TM = 128            # node-row tile
TK = 128            # node-column (reduction) tile
VMEM_LIMIT = 32 * 1024 * 1024   # plenty for (128,128) bf16 tiles, safe on v7x


def _round_up(x, m):
    return (x + m - 1) // m * m


def _pad2(a, rows, cols):
    r, c = a.shape
    return jnp.pad(a, ((0, rows - r), (0, cols - c)))


# ---------------------------------------------------------------- kernels ---

def _xw_kernel(x_ref, w_ref, o_ref):
    # Feature transform: XW = X @ W  (bf16 in, fp32 acc, bf16 out).
    o_ref[...] = jnp.dot(x_ref[...], w_ref[...],
                         preferred_element_type=jnp.float32).astype(o_ref.dtype)


def _agg_kernel(adj_ref, xw_ref, b_ref, o_ref, acc_ref, *, apply_relu):
    # Aggregation: H = A_hat @ XW, reduced over the K grid axis.
    k = pl.program_id(1)

    @pl.when(k == 0)
    def _():
        acc_ref[...] = jnp.zeros_like(acc_ref)

    acc_ref[...] += jnp.dot(adj_ref[...], xw_ref[...],
                            preferred_element_type=jnp.float32)

    @pl.when(k == pl.num_programs(1) - 1)
    def _():
        h = acc_ref[...] + b_ref[...]          # (1, D) bias broadcasts over rows
        if apply_relu:
            h = jnp.maximum(h, 0.0)
        o_ref[...] = h.astype(o_ref.dtype)


def _agg_linear_kernel(adj_ref, xw_ref, b_ref, wl_ref, bl_ref, o_ref, acc_ref):
    # Third GCNConv aggregation fused with the final Linear (lane-dense out).
    k = pl.program_id(1)

    @pl.when(k == 0)
    def _():
        acc_ref[...] = jnp.zeros_like(acc_ref)

    acc_ref[...] += jnp.dot(adj_ref[...], xw_ref[...],
                            preferred_element_type=jnp.float32)

    @pl.when(k == pl.num_programs(1) - 1)
    def _():
        h = jnp.maximum(acc_ref[...] + b_ref[...], 0.0)
        out = jnp.dot(h.astype(jnp.bfloat16), wl_ref[...],
                      preferred_element_type=jnp.float32) + bl_ref[...]
        o_ref[...] = out.astype(o_ref.dtype)


# ----------------------------------------------------------- pallas wraps ---

def feature_transform(h, w):
    """XW = H @ W, tiled over node rows. h:(Np,Din_p) bf16, w:(Din_p,D_p) bf16."""
    n, din = h.shape
    dout = w.shape[1]
    flops = 2 * n * din * dout
    bytes_acc = h.size * 2 + w.size * 2 + n * dout * 2
    return pl.pallas_call(
        _xw_kernel,
        out_shape=jax.ShapeDtypeStruct((n, dout), jnp.bfloat16),
        grid=(n // TM,),
        in_specs=[
            pl.BlockSpec((TM, din), lambda i: (i, 0)),
            pl.BlockSpec((din, dout), lambda i: (0, 0)),   # fetched once
        ],
        out_specs=pl.BlockSpec((TM, dout), lambda i: (i, 0)),
        compiler_params=pltpu.CompilerParams(
            dimension_semantics=("parallel",),
            vmem_limit_bytes=VMEM_LIMIT),
        cost_estimate=pl.CostEstimate(
            flops=flops, transcendentals=0, bytes_accessed=bytes_acc),
    )(h, w)


def aggregate(adj, xw, b2, *, apply_relu, out_dtype):
    """relu(A_hat @ XW + b) with (rows, K) tiling and fp32 VMEM accumulator."""
    n = adj.shape[0]
    dout = xw.shape[1]
    kernel = functools.partial(_agg_kernel, apply_relu=apply_relu)
    flops = 2 * n * n * dout
    bytes_acc = adj.size * 2 + xw.size * 2 + n * dout * jnp.dtype(out_dtype).itemsize
    return pl.pallas_call(
        kernel,
        out_shape=jax.ShapeDtypeStruct((n, dout), out_dtype),
        grid=(n // TM, n // TK),
        in_specs=[
            pl.BlockSpec((TM, TK), lambda i, k: (i, k)),
            pl.BlockSpec((TK, dout), lambda i, k: (k, 0)),
            pl.BlockSpec((1, dout), lambda i, k: (0, 0)),   # bias fetched once
        ],
        out_specs=pl.BlockSpec((TM, dout), lambda i, k: (i, 0)),
        scratch_shapes=[pltpu.VMEM((TM, dout), jnp.float32)],
        compiler_params=pltpu.CompilerParams(
            dimension_semantics=("parallel", "arbitrary"),
            vmem_limit_bytes=VMEM_LIMIT),
        cost_estimate=pl.CostEstimate(
            flops=flops, transcendentals=0, bytes_accessed=bytes_acc),
    )(adj, xw, b2)


def aggregate_linear(adj, xw, b3, wl, bl):
    """Fused: out = relu(A_hat @ XW + b3) @ WL + bL  (128-lane padded output)."""
    n = adj.shape[0]
    dh = xw.shape[1]
    dout = wl.shape[1]
    flops = 2 * n * n * dh + 2 * n * dh * dout
    bytes_acc = adj.size * 2 + xw.size * 2 + wl.size * 2 + n * dout * 4
    return pl.pallas_call(
        _agg_linear_kernel,
        out_shape=jax.ShapeDtypeStruct((n, dout), jnp.float32),
        grid=(n // TM, n // TK),
        in_specs=[
            pl.BlockSpec((TM, TK), lambda i, k: (i, k)),
            pl.BlockSpec((TK, dh), lambda i, k: (k, 0)),
            pl.BlockSpec((1, dh), lambda i, k: (0, 0)),
            pl.BlockSpec((dh, dout), lambda i, k: (0, 0)),
            pl.BlockSpec((1, dout), lambda i, k: (0, 0)),
        ],
        out_specs=pl.BlockSpec((TM, dout), lambda i, k: (i, 0)),
        scratch_shapes=[pltpu.VMEM((TM, dh), jnp.float32)],
        compiler_params=pltpu.CompilerParams(
            dimension_semantics=("parallel", "arbitrary"),
            vmem_limit_bytes=VMEM_LIMIT),
        cost_estimate=pl.CostEstimate(
            flops=flops, transcendentals=0, bytes_accessed=bytes_acc),
    )(adj, xw, b3, wl, bl)


# ------------------------------------------------------------------- glue ---

def normalized_adjacency(edge_index, num_nodes):
    """Dense D^-1/2 (A + I) D^-1/2 matching PyG GCNConv default normalization."""
    src, dst = edge_index[0], edge_index[1]
    loop = jnp.arange(num_nodes, dtype=edge_index.dtype)
    src = jnp.concatenate([src, loop])
    dst = jnp.concatenate([dst, loop])
    deg = jnp.zeros((num_nodes,), jnp.float32).at[dst].add(1.0)
    dinv = jnp.where(deg > 0, jax.lax.rsqrt(deg), 0.0)
    norm = dinv[dst] * dinv[src]
    adj = jnp.zeros((num_nodes, num_nodes), jnp.float32).at[dst, src].add(norm)
    return adj


def init_params(key, dim_in, dim_h, dim_out):
    dims = [dim_in, dim_h * 4, dim_h * 2, dim_h]
    keys = jax.random.split(key, 4)
    params = {}
    for i in range(3):
        fan_in, fan_out = dims[i], dims[i + 1]
        scale = jnp.sqrt(6.0 / (fan_in + fan_out))  # glorot uniform
        params[f"w{i + 1}"] = jax.random.uniform(
            keys[i], (fan_in, fan_out), jnp.float32, -scale, scale)
        params[f"b{i + 1}"] = jnp.zeros((fan_out,), jnp.float32)
    scale = jnp.sqrt(1.0 / dim_h)
    params["wl"] = jax.random.uniform(
        keys[3], (dim_h, dim_out), jnp.float32, -scale, scale)
    params["bl"] = jnp.zeros((dim_out,), jnp.float32)
    return params


def gcn_forward(params, x, edge_index):
    n, din = x.shape
    n_pad = _round_up(n, TM)

    adj = normalized_adjacency(edge_index, n)
    adj_p = _pad2(adj, n_pad, n_pad).astype(jnp.bfloat16)

    h = _pad2(x, n_pad, _round_up(din, LANE)).astype(jnp.bfloat16)

    # GCNConv 1 & 2: relu(A_hat @ (H W) + b); bf16 activations between layers.
    for i in (1, 2):
        w, b = params[f"w{i}"], params[f"b{i}"]
        w_p = _pad2(w, h.shape[1], _round_up(w.shape[1], LANE)).astype(jnp.bfloat16)
        b_p = _pad2(b.reshape(1, -1), 1, w_p.shape[1]).astype(jnp.float32)
        xw = feature_transform(h, w_p)
        h = aggregate(adj_p, xw, b_p, apply_relu=True, out_dtype=jnp.bfloat16)
        # TODO(synk): F.dropout(p=0.5) is identity in eval mode (GCN.test()).

    # GCNConv 3 fused with the final Linear (Dout padded to 128 lanes).
    w3, b3 = params["w3"], params["b3"]
    wl, bl = params["wl"], params["bl"]
    w3_p = _pad2(w3, h.shape[1], _round_up(w3.shape[1], LANE)).astype(jnp.bfloat16)
    b3_p = _pad2(b3.reshape(1, -1), 1, w3_p.shape[1]).astype(jnp.float32)
    wl_p = _pad2(wl, w3_p.shape[1], _round_up(wl.shape[1], LANE)).astype(jnp.bfloat16)
    bl_p = _pad2(bl.reshape(1, -1), 1, wl_p.shape[1]).astype(jnp.float32)

    xw3 = feature_transform(h, w3_p)
    out_p = aggregate_linear(adj_p, xw3, b3_p, wl_p, bl_p)
    return out_p[:n, :wl.shape[1]]


def gcn_reference(params, x, edge_index):
    """Pure-JAX reference mirroring the kernel numerics (bf16 in, fp32 acc)."""
    n = x.shape[0]
    adj = normalized_adjacency(edge_index, n).astype(jnp.bfloat16)
    h = x.astype(jnp.bfloat16)
    for i in (1, 2, 3):
        w = params[f"w{i}"].astype(jnp.bfloat16)
        b = params[f"b{i}"]
        xw = jnp.dot(h, w, preferred_element_type=jnp.float32).astype(jnp.bfloat16)
        agg = jnp.dot(adj, xw, preferred_element_type=jnp.float32)
        h = jnp.maximum(agg + b, 0.0).astype(jnp.bfloat16)
    out = jnp.dot(h, params["wl"].astype(jnp.bfloat16),
                  preferred_element_type=jnp.float32) + params["bl"]
    return out


# ------------------------------------------------------------------- main ---

if __name__ == "__main__":
    key = jax.random.PRNGKey(0)
    k_x, k_e, k_p = jax.random.split(key, 3)

    num_nodes = 200   # pads to 256 -> (2, 2) tile grid
    num_edges = 800
    dim_in = 16       # dataset.num_features (small synthetic)
    dim_h = 8         # hidden (small synthetic; original uses 128)
    dim_out = 1

    x = jax.random.normal(k_x, (num_nodes, dim_in), jnp.float32)
    edge_index = jax.random.randint(k_e, (2, num_edges), 0, num_nodes, jnp.int32)

    params = init_params(k_p, dim_in, dim_h, dim_out)

    out = jax.jit(gcn_forward)(params, x, edge_index)
    out = jax.block_until_ready(out)

    assert out.shape == (num_nodes, dim_out)
    assert bool(jnp.all(jnp.isfinite(out)))

    ref = gcn_reference(params, x, edge_index)
    assert bool(jnp.allclose(out, ref, rtol=5e-2, atol=5e-2))

    print("KERNEL_OK")
</pallas_src>

<mosaic_0001>
module attributes {stable_mosaic.version = 11 : i64} {
  func.func private @main(%arg0: i32) attributes {dimension_semantics = [#tpu.dimension_semantics<core_parallel>], iteration_bounds = array<i64: 2>, tpu.core_type = #tpu.core_type<sc_scalar_subcore>, window_params = []} {
    return
  }
}

module attributes {stable_mosaic.version = 11 : i64} {
  func.func private @main(%arg0: i32) attributes {dimension_semantics = [#tpu.dimension_semantics<core_parallel>], iteration_bounds = array<i64: 2>, tpu.core_type = #tpu.core_type<sc_scalar_subcore>, window_params = []} {
    return
  }
}

module attributes {stable_mosaic.version = 11 : i64} {
  func.func @_agg_kernel(%arg0: i32, %arg1: i32, %arg2: memref<128x128xbf16, #tpu.memory_space<vmem>>, %arg3: memref<128x128xbf16, #tpu.memory_space<vmem>>, %arg4: memref<1x128xf32, #tpu.memory_space<vmem>>, %arg5: memref<128x128xbf16, #tpu.memory_space<vmem>>, %arg6: memref<128x128xf32, #tpu.memory_space<vmem>>) attributes {dimension_semantics = [#tpu.dimension_semantics<parallel>, #tpu.dimension_semantics<arbitrary>], iteration_bounds = array<i64: 2, 2>, scalar_prefetch = 0 : i64, scratch_operands = 1 : i64, tpu.core_type = #tpu.core_type<tc>, window_params = [{transform_indices = @transform_0, window_bounds = array<i64: 128, 128>}, {transform_indices = @transform_1, window_bounds = array<i64: 128, 128>}, {pipeline_mode = #tpu.pipeline_mode<synchronous>, transform_indices = @transform_2, window_bounds = array<i64: 1, 128>}, {transform_indices = @transform_3, window_bounds = array<i64: 128, 128>}]} {
    %c0_i32 = arith.constant 0 : i32
    %0 = arith.cmpi eq, %arg1, %c0_i32 : i32
    %1 = arith.extui %0 : i1 to i32
    %c0_i32_0 = arith.constant 0 : i32
    %2 = arith.cmpi ne, %1, %c0_i32_0 : i32
    scf.if %2 {
      %cst_9 = arith.constant 0.000000e+00 : f32
      %12 = vector.broadcast %cst_9 : f32 to vector<128x128xf32>
      %c0_10 = arith.constant 0 : index
      %c0_11 = arith.constant 0 : index
      %13 = vector.load %arg6[%c0_10, %c0_11] : memref<128x128xf32, #tpu.memory_space<vmem>>, vector<128x128xf32>
      tpu.vector_store %arg6[%c0_10, %c0_11], %12 {strides = array<i32>} : memref<128x128xf32, #tpu.memory_space<vmem>>, vector<128x128xf32>,
    } else {
    }
    %c0 = arith.constant 0 : index
    %c0_1 = arith.constant 0 : index
    %3 = vector.load %arg6[%c0, %c0_1] : memref<128x128xf32, #tpu.memory_space<vmem>>, vector<128x128xf32>
    %c0_2 = arith.constant 0 : index
    %c0_3 = arith.constant 0 : index
    %4 = vector.load %arg2[%c0_2, %c0_3] : memref<128x128xbf16, #tpu.memory_space<vmem>>, vector<128x128xbf16>
    %c0_4 = arith.constant 0 : index
    %c0_5 = arith.constant 0 : index
    %5 = vector.load %arg3[%c0_4, %c0_5] : memref<128x128xbf16, #tpu.memory_space<vmem>>, vector<128x128xbf16>
    %cst = arith.constant dense<0.000000e+00> : vector<128x128xf32>
    %6 = tpu.matmul %4, %5, %cst {dimension_numbers = #tpu.dot_dimension_numbers<[1], [0], [0], [1], [0, 0, 1, 1], [], []>} : vector<128x128xbf16>, vector<128x128xbf16>, vector<128x128xf32> -> vector<128x128xf32>
    %7 = arith.addf %3, %6 : vector<128x128xf32>
    %c0_6 = arith.constant 0 : index
    %c0_7 = arith.constant 0 : index
    %8 = vector.load %arg6[%c0_6, %c0_7] : memref<128x128xf32, #tpu.memory_space<vmem>>, vector<128x128xf32>
    tpu.vector_store %arg6[%c0_6, %c0_7], %7 {strides = array<i32>} : memref<128x128xf32, #tpu.memory_space<vmem>>, vector<128x128xf32>,
    %c1_i32 = arith.constant 1 : i32
    %9 = arith.cmpi eq, %arg1, %c1_i32 : i32
    %10 = arith.extui %9 : i1 to i32
    %c0_i32_8 = arith.constant 0 : i32
    %11 = arith.cmpi ne, %10, %c0_i32_8 : i32
    scf.if %11 {
      %c0_9 = arith.constant 0 : index
      %c0_10 = arith.constant 0 : index
      %12 = vector.load %arg6[%c0_9, %c0_10] : memref<128x128xf32, #tpu.memory_space<vmem>>, vector<128x128xf32>
      %c0_11 = arith.constant 0 : index
      %c0_12 = arith.constant 0 : index
      %13 = vector.load %arg4[%c0_11, %c0_12] : memref<1x128xf32, #tpu.memory_space<vmem>>, vector<1x128xf32>
      %14 = vector.broadcast %13 : vector<1x128xf32> to vector<128x128xf32>
      %15 = arith.addf %12, %14 : vector<128x128xf32>
      %cst_13 = arith.constant 0.000000e+00 : f32
      %16 = vector.broadcast %cst_13 : f32 to vector<128x128xf32>
      %17 = arith.maximumf %15, %16 : vector<128x128xf32>
      %18 = arith.truncf %17 : vector<128x128xf32> to vector<128x128xbf16>
      %c0_14 = arith.constant 0 : index
      %c0_15 = arith.constant 0 : index
      %19 = vector.load %arg5[%c0_14, %c0_15] : memref<128x128xbf16, #tpu.memory_space<vmem>>, vector<128x128xbf16>
      tpu.vector_store %arg5[%c0_14, %c0_15], %18 {strides = array<i32>} : memref<128x128xbf16, #tpu.memory_space<vmem>>, vector<128x128xbf16>,
    } else {
    }
    return
  }
  func.func @transform_0(%arg0: i32, %arg1: i32) -> (i32, i32) {
    %c0_i32 = arith.constant 0 : i32
    return %arg0, %arg1 : i32, i32
  }
  func.func @transform_1(%arg0: i32, %arg1: i32) -> (i32, i32) {
    %c0_i32 = arith.constant 0 : i32
    %c0_i32_0 = arith.constant 0 : i32
    return %arg1, %c0_i32 : i32, i32
  }
  func.func @transform_2(%arg0: i32, %arg1: i32) -> (i32, i32) {
    %c0_i32 = arith.constant 0 : i32
    %c0_i32_0 = arith.constant 0 : i32
    %c0_i32_1 = arith.constant 0 : i32
    return %c0_i32, %c0_i32_0 : i32, i32
  }
  func.func @transform_3(%arg0: i32, %arg1: i32) -> (i32, i32) {
    %c0_i32 = arith.constant 0 : i32
    %c0_i32_0 = arith.constant 0 : i32
    return %arg0, %c0_i32 : i32, i32
  }
}

module attributes {stable_mosaic.version = 11 : i64} {
  func.func @_xw_kernel(%arg0: i32, %arg1: memref<128x128xbf16, #tpu.memory_space<vmem>>, %arg2: memref<128x128xbf16, #tpu.memory_space<vmem>>, %arg3: memref<128x128xbf16, #tpu.memory_space<vmem>>) attributes {dimension_semantics = [#tpu.dimension_semantics<parallel>], iteration_bounds = array<i64: 2>, scalar_prefetch = 0 : i64, scratch_operands = 0 : i64, tpu.core_type = #tpu.core_type<tc>, window_params = [{transform_indices = @transform_0, window_bounds = array<i64: 128, 128>}, {pipeline_mode = #tpu.pipeline_mode<synchronous>, transform_indices = @transform_1, window_bounds = array<i64: 128, 128>}, {transform_indices = @transform_2, window_bounds = array<i64: 128, 128>}]} {
    %c0 = arith.constant 0 : index
    %c0_0 = arith.constant 0 : index
    %0 = vector.load %arg1[%c0, %c0_0] : memref<128x128xbf16, #tpu.memory_space<vmem>>, vector<128x128xbf16>
    %c0_1 = arith.constant 0 : index
    %c0_2 = arith.constant 0 : index
    %1 = vector.load %arg2[%c0_1, %c0_2] : memref<128x128xbf16, #tpu.memory_space<vmem>>, vector<128x128xbf16>
    %cst = arith.constant dense<0.000000e+00> : vector<128x128xf32>
    %2 = tpu.matmul %0, %1, %cst {dimension_numbers = #tpu.dot_dimension_numbers<[1], [0], [0], [1], [0, 0, 1, 1], [], []>} : vector<128x128xbf16>, vector<128x128xbf16>, vector<128x128xf32> -> vector<128x128xf32>
    %3 = arith.truncf %2 : vector<128x128xf32> to vector<128x128xbf16>
    %c0_3 = arith.constant 0 : index
    %c0_4 = arith.constant 0 : index
    %4 = vector.load %arg3[%c0_3, %c0_4] : memref<128x128xbf16, #tpu.memory_space<vmem>>, vector<128x128xbf16>
    tpu.vector_store %arg3[%c0_3, %c0_4], %3 {strides = array<i32>} : memref<128x128xbf16, #tpu.memory_space<vmem>>, vector<128x128xbf16>,
    return
  }
  func.func @transform_0(%arg0: i32) -> (i32, i32) {
    %c0_i32 = arith.constant 0 : i32
    %c0_i32_0 = arith.constant 0 : i32
    return %arg0, %c0_i32 : i32, i32
  }
  func.func @transform_1(%arg0: i32) -> (i32, i32) {
    %c0_i32 = arith.constant 0 : i32
    %c0_i32_0 = arith.constant 0 : i32
    %c0_i32_1 = arith.constant 0 : i32
    return %c0_i32, %c0_i32_0 : i32, i32
  }
  func.func @transform_2(%arg0: i32) -> (i32, i32) {
    %c0_i32 = arith.constant 0 : i32
    %c0_i32_0 = arith.constant 0 : i32
    return %arg0, %c0_i32 : i32, i32
  }
}

module attributes {stable_mosaic.version = 11 : i64} {
  func.func @_agg_linear_kernel(%arg0: i32, %arg1: i32, %arg2: memref<128x128xbf16, #tpu.memory_space<vmem>>, %arg3: memref<128x128xbf16, #tpu.memory_space<vmem>>, %arg4: memref<1x128xf32, #tpu.memory_space<vmem>>, %arg5: memref<128x128xbf16, #tpu.memory_space<vmem>>, %arg6: memref<1x128xf32, #tpu.memory_space<vmem>>, %arg7: memref<128x128xf32, #tpu.memory_space<vmem>>, %arg8: memref<128x128xf32, #tpu.memory_space<vmem>>) attributes {dimension_semantics = [#tpu.dimension_semantics<parallel>, #tpu.dimension_semantics<arbitrary>], iteration_bounds = array<i64: 2, 2>, scalar_prefetch = 0 : i64, scratch_operands = 1 : i64, tpu.core_type = #tpu.core_type<tc>, window_params = [{transform_indices = @transform_0, window_bounds = array<i64: 128, 128>}, {transform_indices = @transform_1, window_bounds = array<i64: 128, 128>}, {pipeline_mode = #tpu.pipeline_mode<synchronous>, transform_indices = @transform_2, window_bounds = array<i64: 1, 128>}, {pipeline_mode = #tpu.pipeline_mode<synchronous>, transform_indices = @transform_3, window_bounds = array<i64: 128, 128>}, {pipeline_mode = #tpu.pipeline_mode<synchronous>, transform_indices = @transform_4, window_bounds = array<i64: 1, 128>}, {transform_indices = @transform_5, window_bounds = array<i64: 128, 128>}]} {
    %c0_i32 = arith.constant 0 : i32
    %0 = arith.cmpi eq, %arg1, %c0_i32 : i32
    %1 = arith.extui %0 : i1 to i32
    %c0_i32_0 = arith.constant 0 : i32
    %2 = arith.cmpi ne, %1, %c0_i32_0 : i32
    scf.if %2 {
      %cst_9 = arith.constant 0.000000e+00 : f32
      %12 = vector.broadcast %cst_9 : f32 to vector<128x128xf32>
      %c0_10 = arith.constant 0 : index
      %c0_11 = arith.constant 0 : index
      %13 = vector.load %arg8[%c0_10, %c0_11] : memref<128x128xf32, #tpu.memory_space<vmem>>, vector<128x128xf32>
      tpu.vector_store %arg8[%c0_10, %c0_11], %12 {strides = array<i32>} : memref<128x128xf32, #tpu.memory_space<vmem>>, vector<128x128xf32>,
    } else {
    }
    %c0 = arith.constant 0 : index
    %c0_1 = arith.constant 0 : index
    %3 = vector.load %arg8[%c0, %c0_1] : memref<128x128xf32, #tpu.memory_space<vmem>>, vector<128x128xf32>
    %c0_2 = arith.constant 0 : index
    %c0_3 = arith.constant 0 : index
    %4 = vector.load %arg2[%c0_2, %c0_3] : memref<128x128xbf16, #tpu.memory_space<vmem>>, vector<128x128xbf16>
    %c0_4 = arith.constant 0 : index
    %c0_5 = arith.constant 0 : index
    %5 = vector.load %arg3[%c0_4, %c0_5] : memref<128x128xbf16, #tpu.memory_space<vmem>>, vector<128x128xbf16>
    %cst = arith.constant dense<0.000000e+00> : vector<128x128xf32>
    %6 = tpu.matmul %4, %5, %cst {dimension_numbers = #tpu.dot_dimension_numbers<[1], [0], [0], [1], [0, 0, 1, 1], [], []>} : vector<128x128xbf16>, vector<128x128xbf16>, vector<128x128xf32> -> vector<128x128xf32>
    %7 = arith.addf %3, %6 : vector<128x128xf32>
    %c0_6 = arith.constant 0 : index
    %c0_7 = arith.constant 0 : index
    %8 = vector.load %arg8[%c0_6, %c0_7] : memref<128x128xf32, #tpu.memory_space<vmem>>, vector<128x128xf32>
    tpu.vector_store %arg8[%c0_6, %c0_7], %7 {strides = array<i32>} : memref<128x128xf32, #tpu.memory_space<vmem>>, vector<128x128xf32>,
    %c1_i32 = arith.constant 1 : i32
    %9 = arith.cmpi eq, %arg1, %c1_i32 : i32
    %10 = arith.extui %9 : i1 to i32
    %c0_i32_8 = arith.constant 0 : i32
    %11 = arith.cmpi ne, %10, %c0_i32_8 : i32
    scf.if %11 {
      %c0_9 = arith.constant 0 : index
      %c0_10 = arith.constant 0 : index
      %12 = vector.load %arg8[%c0_9, %c0_10] : memref<128x128xf32, #tpu.memory_space<vmem>>, vector<128x128xf32>
      %c0_11 = arith.constant 0 : index
      %c0_12 = arith.constant 0 : index
      %13 = vector.load %arg4[%c0_11, %c0_12] : memref<1x128xf32, #tpu.memory_space<vmem>>, vector<1x128xf32>
      %14 = vector.broadcast %13 : vector<1x128xf32> to vector<128x128xf32>
      %15 = arith.addf %12, %14 : vector<128x128xf32>
      %cst_13 = arith.constant 0.000000e+00 : f32
      %16 = vector.broadcast %cst_13 : f32 to vector<128x128xf32>
      %17 = arith.maximumf %15, %16 : vector<128x128xf32>
      %18 = arith.truncf %17 : vector<128x128xf32> to vector<128x128xbf16>
      %c0_14 = arith.constant 0 : index
      %c0_15 = arith.constant 0 : index
      %19 = vector.load %arg5[%c0_14, %c0_15] : memref<128x128xbf16, #tpu.memory_space<vmem>>, vector<128x128xbf16>
      %cst_16 = arith.constant dense<0.000000e+00> : vector<128x128xf32>
      %20 = tpu.matmul %18, %19, %cst_16 {dimension_numbers = #tpu.dot_dimension_numbers<[1], [0], [0], [1], [0, 0, 1, 1], [], []>} : vector<128x128xbf16>, vector<128x128xbf16>, vector<128x128xf32> -> vector<128x128xf32>
      %c0_17 = arith.constant 0 : index
      %c0_18 = arith.constant 0 : index
      %21 = vector.load %arg6[%c0_17, %c0_18] : memref<1x128xf32, #tpu.memory_space<vmem>>, vector<1x128xf32>
      %22 = vector.broadcast %21 : vector<1x128xf32> to vector<128x128xf32>
      %23 = arith.addf %20, %22 : vector<128x128xf32>
      %c0_19 = arith.constant 0 : index
      %c0_20 = arith.constant 0 : index
      %24 = vector.load %arg7[%c0_19, %c0_20] : memref<128x128xf32, #tpu.memory_space<vmem>>, vector<128x128xf32>
      tpu.vector_store %arg7[%c0_19, %c0_20], %23 {strides = array<i32>} : memref<128x128xf32, #tpu.memory_space<vmem>>, vector<128x128xf32>,
    } else {
    }
    return
  }
  func.func @transform_0(%arg0: i32, %arg1: i32) -> (i32, i32) {
    %c0_i32 = arith.constant 0 : i32
    return %arg0, %arg1 : i32, i32
  }
  func.func @transform_1(%arg0: i32, %arg1: i32) -> (i32, i32) {
    %c0_i32 = arith.constant 0 : i32
    %c0_i32_0 = arith.constant 0 : i32
    return %arg1, %c0_i32 : i32, i32
  }
  func.func @transform_2(%arg0: i32, %arg1: i32) -> (i32, i32) {
    %c0_i32 = arith.constant 0 : i32
    %c0_i32_0 = arith.constant 0 : i32
    %c0_i32_1 = arith.constant 0 : i32
    return %c0_i32, %c0_i32_0 : i32, i32
  }
  func.func @transform_3(%arg0: i32, %arg1: i32) -> (i32, i32) {
    %c0_i32 = arith.constant 0 : i32
    %c0_i32_0 = arith.constant 0 : i32
    %c0_i32_1 = arith.constant 0 : i32
    return %c0_i32, %c0_i32_0 : i32, i32
  }
  func.func @transform_4(%arg0: i32, %arg1: i32) -> (i32, i32) {
    %c0_i32 = arith.constant 0 : i32
    %c0_i32_0 = arith.constant 0 : i32
    %c0_i32_1 = arith.constant 0 : i32
    return %c0_i32, %c0_i32_0 : i32, i32
  }
  func.func @transform_5(%arg0: i32, %arg1: i32) -> (i32, i32) {
    %c0_i32 = arith.constant 0 : i32
    %c0_i32_0 = arith.constant 0 : i32
    return %arg0, %c0_i32 : i32, i32
  }
}

</mosaic_0001>

<bundles_post_ra>
// kernel: mul.1
= control target key start
LH: loop header
LB: loop body
LE: loop exit
PB: predicated region body
PF: predicated region fallthrough
CT: control target
= control target key end

     0   :  { %s34_s0 = inlined_call_operand.vmem [shape: f32[1000], index: 0, kind: input, shape index: {}]   ;;  %s35_s1 = inlined_call_operand.vmem [shape: f32[1000], index: 1, kind: input, shape index: {}]   ;;  %s36_s2 = inlined_call_operand.vmem [shape: f32[1000], index: 2, kind: output, shape index: {}]  }
   0x1   :  { %v3_v0 = vld [vmem:[%s34_s0] sm:$0xff] }
   0x2   :  { %v4_v1 = vld [vmem:[%s35_s1] sm:$0xff] }
   0x3   :  { %v7_v2 = vmul.f32 %v4_v1, %v3_v0 }
   0x5   :  { %9 = vst [vmem:[%s36_s2] sm:$0xff] %v7_v2 }

// kernel: gcn_forward.6
= control target key start
LH: loop header
LB: loop body
LE: loop exit
PB: predicated region body
PF: predicated region fallthrough
CT: control target
= control target key end

     0   :  { %s726_s9 = smov 0   ;;  %s784_s0 = inlined_call_operand.vmem [shape: bf16[256,128], index: 0, kind: input, shape index: {}]   ;;  %s785_s1 = inlined_call_operand.vmem [shape: bf16[128,128], index: 1, kind: input, shape index: {}]   ;;  %s786_s2 = inlined_call_operand.vmem [shape: bf16[256,128], index: 2, kind: output, shape index: {}]  }
   0x1 LB: > { %s509_s10 = sadd.s32 4294967295, %s709_s9   ;;  %p513_p0 = scmp.ge.s32.totalorder %s709_s9, 1  ;;  %s709_s9 = sphi %s726_s9, %s12_s9  }
   0x2   : > { %p113_p1 = scmp.lt.s32.totalorder %s709_s9, 3 }
   0x4   : > { %p114_p2 = pnand %p513_p0, %p113_p1 }
   0x5   : > { %s514_s13 = sshll.u32 (!%p114_p2), %s509_s10, 4 }
   0x6   : > { %117 = sbr.rel (%p114_p2) target bundleno = 254 (0xfe), region = 28  ;;  %p136_p3 = scmp.lt.s32.totalorder (!%p114_p2), %s514_s13, 31 }
   0xb   : > { %v687_v0 = vld [vmem:[%s785_s1 + $0x38] sm:$0xff]   ;;  %v688_v1 = vld [vmem:[%s785_s1 + $0x30] sm:$0xff]   ;;  %s788_s13 = smov (!%p136_p3, %s514_s13), 31  ;;  %v689_v2 = vld [vmem:[%s785_s1 + $0x28] sm:$0xff]  }
   0xc   : > { %631 = vmatprep.subr.bf16.mxu0 %v687_v0  ;;  %663 = vmatprep.subr.bf16.mxu1 %v687_v0  ;;  %s515_s18 = sshll.u32 %s788_s13, 2  ;;  %v690_v3 = vld [vmem:[%s785_s1 + $0x20] sm:$0xff]   ;;  %v691_v6 = vld [vmem:[%s785_s1 + $0x18] sm:$0xff]   ;;  %v692_v7 = vld [vmem:[%s785_s1 + $0x10] sm:$0xff]  }
   0xd   : > { %632 = vmatpush3.bf16.msra.mxu0 %v687_v0  ;;  %671 = vmatpush3.bf16.msra.mxu1 %v687_v0  ;;  %s751_s21 = scalar_lea.vmem %s784_s0, %s515_s18  ;;  %v693_v8 = vld [vmem:[%s785_s1 + $0x8] sm:$0xff]   ;;  %v694_v9 = vld [vmem:[%s785_s1] sm:$0xff]   ;;  %s145_s6 = scalar_lea.vmem %s786_s2, %s515_s18 }
   0xe   : > { %633 = vmatprep.subr.bf16.mxu0 %v688_v1  ;;  %664 = vmatprep.subr.bf16.mxu1 %v688_v1  ;;  %v695_v4 = vld [vmem:[%s751_s21] sm:$0xff]   ;;  %v697_v10 = vld [vmem:[%s751_s21 + $0x8] sm:$0xff]   ;;  %v699_v12 = vld [vmem:[%s751_s21 + $0x10] sm:$0xff]  }
   0xf   : > { %v696_v5 = vld [vmem:[%s751_s21 + $0x20] sm:$0xff]   ;;  %647 = vmatprep.mubr.bf16.mxu0 %v695_v4  ;;  %v698_v11 = vld [vmem:[%s751_s21 + $0x28] sm:$0xff]   ;;  %v700_v13 = vld [vmem:[%s751_s21 + $0x30] sm:$0xff]  }
  0x10   : > { %655 = vmatprep.mubr.bf16.mxu1 %v696_v5  ;;  %v701_v14 = vld [vmem:[%s751_s21 + $0x18] sm:$0xff]  }
  0x11   : > { %634 = vmatpush3.bf16.msra.mxu0 %v688_v1  ;;  %672 = vmatpush3.bf16.msra.mxu1 %v688_v1  ;;  %v702_v15 = vld [vmem:[%s751_s21 + $0x38] sm:$0xff]  }
  0x12   : > { %635 = vmatprep.subr.bf16.mxu0 %v689_v2  ;;  %665 = vmatprep.subr.bf16.mxu1 %v689_v2 }
  0x15   : > { %636 = vmatpush3.bf16.msra.mxu0 %v689_v2  ;;  %673 = vmatpush3.bf16.msra.mxu1 %v689_v2 }
  0x16   : > { %637 = vmatprep.subr.bf16.mxu0 %v690_v3  ;;  %666 = vmatprep.subr.bf16.mxu1 %v690_v3 }
  0x19   : > { %638 = vmatpush3.bf16.msra.mxu0 %v690_v3  ;;  %674 = vmatpush3.bf16.msra.mxu1 %v690_v3 }
  0x1a   : > { %639 = vmatprep.subr.bf16.mxu0 %v691_v6  ;;  %667 = vmatprep.subr.bf16.mxu1 %v691_v6 }
  0x1d   : > { %640 = vmatpush3.bf16.msra.mxu0 %v691_v6  ;;  %675 = vmatpush3.bf16.msra.mxu1 %v691_v6 }
  0x1e   : > { %641 = vmatprep.subr.bf16.mxu0 %v692_v7  ;;  %668 = vmatprep.subr.bf16.mxu1 %v692_v7 }
  0x21   : > { %642 = vmatpush3.bf16.msra.mxu0 %v692_v7  ;;  %676 = vmatpush3.bf16.msra.mxu1 %v692_v7 }
  0x22   : > { %643 = vmatprep.subr.bf16.mxu0 %v693_v8  ;;  %669 = vmatprep.subr.bf16.mxu1 %v693_v8 }
  0x25   : > { %644 = vmatpush3.bf16.msra.mxu0 %v693_v8  ;;  %677 = vmatpush3.bf16.msra.mxu1 %v693_v8 }
  0x26   : > { %645 = vmatprep.subr.bf16.mxu0 %v694_v9  ;;  %670 = vmatprep.subr.bf16.mxu1 %v694_v9 }
  0x29   : > { %646 = vmatpush3.bf16.msra.mxu0 %v694_v9  ;;  %678 = vmatpush3.bf16.msra.mxu1 %v694_v9 }
  0x2c   : > { %648 = vmatmul.mubr.bf16.vlgmr.msra.gmra.mxu0 %v697_v10  ;;  %656 = vmatmul.mubr.bf16.vlgmr.msra.gmra.mxu1 %v698_v11 }
  0x2d   : > { %651 = vmatprep.mubr.bf16.mxu0 %v699_v12  ;;  %659 = vmatprep.mubr.bf16.mxu1 %v700_v13 }
  0x34   : > { %652 = vmatmul.mubr.bf16.gmra.mxu0 %v701_v14  ;;  %660 = vmatmul.mubr.bf16.gmra.mxu1 %v702_v15 }
  0xec   : > { %v649_v16 = vpop.f32.mrf.mxu0  ;;  %v657_v17 = vpop.f32.mrf.mxu1 }
  0xee   : > { %v310_v18 = vpop.f32.mrf.mxu0  ;;  %v342_v19 = vpop.f32.mrf.mxu1 }
  0xf0   : > { %v650_v20 = vpop.f32.mrf.mxu0  ;;  %v658_v21 = vpop.f32.mrf.mxu1 }
  0xf1   : > { %v576_v22 = vpack.c.bf16 %v650_v20, %v649_v16  ;;  %v596_v23 = vpack.c.bf16 %v658_v21, %v657_v17 }
  0xf2   : > { %v313_v24 = vpop.f32.mrf.mxu0  ;;  %v345_v25 = vpop.f32.mrf.mxu1 }
  0xf3   : > { %608 = vst [vmem:[%s145_s6 + $0x8] sm:$0xff] %v576_v22   ;;  %612 = vst [vmem:[%s145_s6 + $0x28] sm:$0xff] %v596_v23   ;;  %v571_v26 = vpack.c.bf16 %v313_v24, %v310_v18  ;;  %v591_v27 = vpack.c.bf16 %v345_v25, %v342_v19 }
  0xf4   : > { %v653_v28 = vpop.f32.mrf.mxu0  ;;  %v661_v29 = vpop.f32.mrf.mxu1 }
  0xf5   : > { %572 = vst [vmem:[%s145_s6] sm:$0xff] %v571_v26   ;;  %611 = vst [vmem:[%s145_s6 + $0x20] sm:$0xff] %v591_v27  }
  0xf6   : > { %v326_v30 = vpop.f32.mrf.mxu0  ;;  %v358_v31 = vpop.f32.mrf.mxu1 }
  0xf8   : > { %v654_v32 = vpop.f32.mrf.mxu0  ;;  %v662_v33 = vpop.f32.mrf.mxu1 }
  0xf9   : > { %v586_v34 = vpack.c.bf16 %v654_v32, %v653_v28  ;;  %v606_v35 = vpack.c.bf16 %v662_v33, %v661_v29 }
  0xfa   : > { %v329_v36 = vpop.f32.mrf.mxu0  ;;  %v361_v37 = vpop.f32.mrf.mxu1 }
  0xfb   : > { %610 = vst [vmem:[%s145_s6 + $0x18] sm:$0xff] %v586_v34   ;;  %614 = vst [vmem:[%s145_s6 + $0x38] sm:$0xff] %v606_v35   ;;  %v581_v38 = vpack.c.bf16 %v329_v36, %v326_v30  ;;  %v601_v39 = vpack.c.bf16 %v361_v37, %v358_v31 }
  0xfd   : > { %609 = vst [vmem:[%s145_s6 + $0x10] sm:$0xff] %v581_v38   ;;  %613 = vst [vmem:[%s145_s6 + $0x30] sm:$0xff] %v601_v39  }
  0xfe PF: > { %s12_s9 = sadd.s32 1, %s709_s9  }
  0xff   : > { %p9_p4 = scmp.ge.s32.totalorder %s12_s9, 4  }
 0x101   :  { %11 = sbr.rel (!%p9_p4) target bundleno = 1 (0x1), region = 58 }

// kernel: gcn_forward.7
= control target key start
LH: loop header
LB: loop body
LE: loop exit
PB: predicated region body
PF: predicated region fallthrough
CT: control target
= control target key end

     0   :  { %s1165_s12 = smov 0   ;;  %s1167_s13 = smov 0   ;;  %s1310_s0 = inlined_call_operand.vmem [shape: bf16[256,256], index: 0, kind: input, shape index: {}]   ;;  %s1311_s1 = inlined_call_operand.vmem [shape: bf16[256,128], index: 1, kind: input, shape index: {}]   ;;  %s1312_s2 = inlined_call_operand.vmem [shape: f32[1,128], index: 2, kind: input, shape index: {}]   ;;  %s1313_s3 = inlined_call_operand.vmem [shape: bf16[256,128], index: 3, kind: output, shape index: {}]  }
   0x1   :  { %s1169_s14 = smov 0   ;;  %s1171_s15 = smov 0  }
   0x2   :  { %s1173_s16 = smov 0   ;;  %s1175_s17 = smov 0  }
   0x3   :  { %s1177_s18 = smov 0  }
   0x4 LB: > { %s22_s19 = sadd.s32 1, %s1134_s16  ;;  %s25_s20 = sadd.s32 1, %s1138_s17  ;;  %s1142_s18 = sphi %s1177_s18, %s13_s18   ;;  %s1138_s17 = sphi %s1175_s17, %s1319_s17   ;;  %s1134_s16 = sphi %s1173_s16, %s1318_s16   ;;  %s1130_s15 = sphi %s1171_s15, %s1317_s15   ;;  %s1126_s14 = sphi %s1169_s14, %s1316_s14   ;;  %s1122_s13 = sphi %s1167_s13, %s1315_s13   ;;  %s1118_s12 = sphi %s1165_s12, %s1314_s12  }
   0x5   : > { %p23_p0 = scmp.ge.s32.totalorder %s22_s19, 2  ;;  %p41_p1 = scmp.ne.s32.totalorder %s1122_s13, %s1118_s12 }
   0x6   : > { %p42_p2 = scmp.eq.s32.totalorder %s1142_s18, 0  ;;  %s34_s24 = sadd.s32 1, %s1122_s13 }
   0x7   : > { %s1321_s19 = smov (%p23_p0, %s22_s19), 0  ;;  %s1323_s20 = smov (!%p23_p0, %s25_s20), %s1138_s17 }
   0x8   : > { %p43_p3 = por %p42_p2, %p41_p1  ;;  %p27_p4 = scmp.ge.s32.totalorder %s1323_s20, 2 }
   0x9   : > { %s30_s21 = ssub.s32 %s1134_s16, %s1321_s19  ;;  %p839_p6 = scmp.ge.s32.totalorder %s1142_s18, 4 }
   0xa   : > { %s1325_s20 = smov (%p27_p4, %s1323_s20), 0 }
   0xb   : > { %s29_s22 = ssub.s32 %s1138_s17, %s1325_s20  ;;  %143 = sbr.rel (%p839_p6) target bundleno = 32 (0x20), region = 20 }
   0xc   : > { %s31_s23 = sor.u32 %s30_s21, %s29_s22 }
   0xd   : > { %p32_p5 = scmp.eq.s32.totalorder %s31_s23, 0 }
   0xf   : > { %s1216_s25 = scalar_select %p32_p5, %s1122_s13, %s34_s24  }
  0x10   : > { %146 = sbr.rel (!%p43_p3) target bundleno = 32 (0x20), region = 24  ;;  %s148_s26 = sand.u32 (%p43_p3), 1, %s1122_s13  }
  0x11   : > { %s887_s27 = sshll.u32 (%p43_p3), %s1138_s17, 5  ;;  %s840_s28 = sshll.u32 (%p43_p3), %s148_s26, 6 }
  0x12   : > { %s153_s29 = sadd.s32 (%p43_p3), %s1134_s16, %s887_s27  ;;  %s150_s7 = scalar_lea.vmem (%p43_p3), [#allocation3], %s840_s28 }
  0x13   : > { %s843_s30 = sshll.u32 (%p43_p3), %s153_s29, 2 }
  0x14   : > { %s1225_s6 = scalar_lea.vmem (%p43_p3), %s1310_s0, %s843_s30 }
  0x15   : > { %v172_v0 = vld [vmem:[%s1225_s6] sm:$0xf]  ;;  %v174_v1 = vld [vmem:[%s1225_s6 + $0x8] sm:$0xf]  ;;  %v176_v2 = vld [vmem:[%s1225_s6 + $0x10] sm:$0xf] }
  0x16   : > { %173 = vst [vmem:[%s150_s7] sm:$0xf] %v172_v0  ;;  %175 = vst [vmem:[%s150_s7 + $0x4] sm:$0xf] %v174_v1  ;;  %v178_v3 = vld [vmem:[%s1225_s6 + $0x18] sm:$0xf] }
  0x17   : > { %177 = vst [vmem:[%s150_s7 + $0x8] sm:$0xf] %v176_v2  ;;  %v180_v4 = vld [vmem:[%s1225_s6 + $0x20] sm:$0xf]  ;;  %v182_v5 = vld [vmem:[%s1225_s6 + $0x28] sm:$0xf] }
  0x18   : > { %179 = vst [vmem:[%s150_s7 + $0xc] sm:$0xf] %v178_v3  ;;  %181 = vst [vmem:[%s150_s7 + $0x10] sm:$0xf] %v180_v4  ;;  %v184_v6 = vld [vmem:[%s1225_s6 + $0x30] sm:$0xf] }
  0x19   : > { %183 = vst [vmem:[%s150_s7 + $0x14] sm:$0xf] %v182_v5  ;;  %v186_v7 = vld [vmem:[%s1225_s6 + $0x38] sm:$0xf]  ;;  %v188_v8 = vld [vmem:[%s1225_s6 + $0x40] sm:$0xf] }
  0x1a   : > { %185 = vst [vmem:[%s150_s7 + $0x18] sm:$0xf] %v184_v6  ;;  %187 = vst [vmem:[%s150_s7 + $0x1c] sm:$0xf] %v186_v7  ;;  %v190_v9 = vld [vmem:[%s1225_s6 + $0x48] sm:$0xf] }
  0x1b   : > { %189 = vst [vmem:[%s150_s7 + $0x20] sm:$0xf] %v188_v8  ;;  %v192_v10 = vld [vmem:[%s1225_s6 + $0x50] sm:$0xf]  ;;  %v194_v11 = vld [vmem:[%s1225_s6 + $0x58] sm:$0xf] }
  0x1c   : > { %191 = vst [vmem:[%s150_s7 + $0x24] sm:$0xf] %v190_v9  ;;  %193 = vst [vmem:[%s150_s7 + $0x28] sm:$0xf] %v192_v10  ;;  %v196_v12 = vld [vmem:[%s1225_s6 + $0x60] sm:$0xf] }
  0x1d   : > { %195 = vst [vmem:[%s150_s7 + $0x2c] sm:$0xf] %v194_v11  ;;  %v198_v13 = vld [vmem:[%s1225_s6 + $0x68] sm:$0xf]  ;;  %v200_v14 = vld [vmem:[%s1225_s6 + $0x70] sm:$0xf] }
  0x1e   : > { %197 = vst [vmem:[%s150_s7 + $0x30] sm:$0xf] %v196_v12  ;;  %199 = vst [vmem:[%s150_s7 + $0x34] sm:$0xf] %v198_v13  ;;  %v202_v15 = vld [vmem:[%s1225_s6 + $0x78] sm:$0xf] }
  0x1f   : > { %201 = vst [vmem:[%s150_s7 + $0x38] sm:$0xf] %v200_v14  ;;  %203 = vst [vmem:[%s150_s7 + $0x3c] sm:$0xf] %v202_v15 }
  0x20 PF: > { %p844_p7 = scmp.ge.s32.totalorder %s1142_s18, 1  ;;  %p267_p8 = scmp.lt.s32.totalorder %s1142_s18, 5 }
  0x22   : > { %p268_p9 = pnand %p844_p7, %p267_p8 }
  0x23   : > { %s274_s8 = sand.u32 (!%p268_p9), 1, %s1118_s12   ;;  %s846_s9 = sshll.u32 (!%p268_p9), %s1126_s14, 4 }
  0x24   : > { %271 = sbr.rel (%p268_p9) target bundleno = 317 (0x13d), region = 69  ;;  %s845_s10 = sshll.u32 (!%p268_p9), %s274_s8, 6 }
  0x25   : > { %p304_p10 = scmp.lt.s32.totalorder (!%p268_p9), %s846_s9, 31  ;;  %s848_s11 = sshll.u32 (!%p268_p9), %s1130_s15, 4 }
  0x26   : > { %p310_p11 = scmp.lt.s32.totalorder (!%p268_p9), %s848_s11, 31  ;;  %s1258_s12 = scalar_lea.vmem (!%p268_p9), [#allocation3], %s845_s10 }
  0x27   : > { %p850_p12 = scmp.ne.s32.totalorder (!%p268_p9), %s1126_s14, 0 }
  0x29   : > { %s1327_s9 = smov (!%p304_p10, %s846_s9), 31  ;;  %s1329_s11 = smov (!%p310_p11, %s848_s11), 31 }
  0x2a   : > { %s847_s21 = sshll.u32 %s1327_s9, 2  ;;  %s849_s26 = sshll.u32 %s1329_s11, 2 }
  0x2b   : > { %s1251_s24 = scalar_lea.vmem %s1311_s1, %s847_s21  ;;  %s1256_s29 = scalar_lea.vmem %s1313_s3, %s849_s26 }
  0x2c   : > { %319 = sbr.rel (%p850_p12) target bundleno = 58 (0x3a), region = 77 }
  0x31   : > { %v1144_v16 = vmov 0.0  }
  0x32   : > { %320 = vst [vmem:[#allocation2 + $0x30] sm:$0xff] %v1144_v16  ;;  %321 = vst [vmem:[#allocation2] sm:$0xff] %v1144_v16 }
  0x33   : > { %322 = vst [vmem:[#allocation2 + $0x58] sm:$0xff] %v1144_v16  ;;  %323 = vst [vmem:[#allocation2 + $0x18] sm:$0xff] %v1144_v16 }
  0x34   : > { %324 = vst [vmem:[#allocation2 + $0x50] sm:$0xff] %v1144_v16  ;;  %325 = vst [vmem:[#allocation2 + $0x68] sm:$0xff] %v1144_v16 }
  0x35   : > { %326 = vst [vmem:[#allocation2 + $0x8] sm:$0xff] %v1144_v16  ;;  %327 = vst [vmem:[#allocation2 + $0x48] sm:$0xff] %v1144_v16 }
  0x36   : > { %328 = vst [vmem:[#allocation2 + $0x40] sm:$0xff] %v1144_v16  ;;  %329 = vst [vmem:[#allocation2 + $0x20] sm:$0xff] %v1144_v16 }
  0x37   : > { %330 = vst [vmem:[#allocation2 + $0x10] sm:$0xff] %v1144_v16  ;;  %331 = vst [vmem:[#allocation2 + $0x38] sm:$0xff] %v1144_v16 }
  0x38   : > { %332 = vst [vmem:[#allocation2 + $0x60] sm:$0xff] %v1144_v16  ;;  %333 = vst [vmem:[#allocation2 + $0x70] sm:$0xff] %v1144_v16 }
  0x39   : > { %334 = vst [vmem:[#allocation2 + $0x78] sm:$0xff] %v1144_v16  ;;  %335 = vst [vmem:[#allocation2 + $0x28] sm:$0xff] %v1144_v16 }
  0x3a PF: > { %v1072_v17 = vld [vmem:[%s1251_s24 + $0x38] sm:$0xff]   ;;  %v1073_v18 = vld [vmem:[%s1251_s24 + $0x30] sm:$0xff]   ;;  %v1074_v19 = vld [vmem:[%s1251_s24 + $0x28] sm:$0xff]   ;;  %p867_p13 = scmp.ne.s32.totalorder %s1126_s14, 1 }
  0x3b   : > { %967 = vmatprep.subr.bf16.mxu0 %v1072_v17  ;;  %999 = vmatprep.subr.bf16.mxu1 %v1072_v17  ;;  %v1075_v20 = vld [vmem:[%s1251_s24 + $0x20] sm:$0xff]   ;;  %v1076_v23 = vld [vmem:[%s1251_s24 + $0x18] sm:$0xff]   ;;  %v1077_v24 = vld [vmem:[%s1251_s24 + $0x10] sm:$0xff]  }
  0x3c   : > { %968 = vmatpush3.bf16.msra.mxu0 %v1072_v17  ;;  %1007 = vmatpush3.bf16.msra.mxu1 %v1072_v17  ;;  %v1080_v21 = vld [vmem:[%s1258_s12] sm:$0xff]   ;;  %v1078_v25 = vld [vmem:[%s1251_s24 + $0x8] sm:$0xff]   ;;  %v1084_v29 = vld [vmem:[%s1258_s12 + $0x10] sm:$0xff]  }
  0x3d   : > { %969 = vmatprep.subr.bf16.mxu0 %v1073_v18  ;;  %1000 = vmatprep.subr.bf16.mxu1 %v1073_v18  ;;  %v1081_v22 = vld [vmem:[%s1258_s12 + $0x20] sm:$0xff]   ;;  %v1082_v27 = vld [vmem:[%s1258_s12 + $0x8] sm:$0xff]   ;;  %v1085_v30 = vld [vmem:[%s1258_s12 + $0x30] sm:$0xff]  }
  0x3e   : > { %983 = vmatprep.mubr.bf16.mxu0 %v1080_v21  ;;  %991 = vmatprep.mubr.bf16.mxu1 %v1081_v22  ;;  %v1079_v26 = vld [vmem:[%s1251_s24] sm:$0xff]   ;;  %v1083_v28 = vld [vmem:[%s1258_s12 + $0x28] sm:$0xff]   ;;  %v1086_v31 = vld [vmem:[%s1258_s12 + $0x18] sm:$0xff]  }
  0x3f   : > { %v1087_v32 = vld [vmem:[%s1258_s12 + $0x38] sm:$0xff]   ;;  %v346_v34 = vld [vmem:[#allocation2 + $0x10] sm:$0xff]  ;;  %v344_v38 = vld [vmem:[#allocation2 + $0x40] sm:$0xff] }
  0x40   : > { %970 = vmatpush3.bf16.msra.mxu0 %v1073_v18  ;;  %1008 = vmatpush3.bf16.msra.mxu1 %v1073_v18  ;;  %v338_v33 = vld [vmem:[#allocation2 + $0x58] sm:$0xff]  ;;  %v336_v37 = vld [vmem:[#allocation2 + $0x30] sm:$0xff]  ;;  %v337_v49 = vld [vmem:[#allocation2] sm:$0xff] }
  0x41   : > { %971 = vmatprep.subr.bf16.mxu0 %v1074_v19  ;;  %1001 = vmatprep.subr.bf16.mxu1 %v1074_v19  ;;  %v339_v43 = vld [vmem:[#allocation2 + $0x18] sm:$0xff]  ;;  %v345_v50 = vld [vmem:[#allocation2 + $0x20] sm:$0xff]  ;;  %v342_v55 = vld [vmem:[#allocation2 + $0x8] sm:$0xff] }
  0x42   : > { %v347_v44 = vld [vmem:[#allocation2 + $0x38] sm:$0xff]  ;;  %v340_v61 = vld [vmem:[#allocation2 + $0x50] sm:$0xff]  ;;  %v348_v62 = vld [vmem:[#allocation2 + $0x60] sm:$0xff] }
  0x43   : > { %v350_v56 = vld [vmem:[#allocation2 + $0x78] sm:$0xff]  ;;  %v343_v3 = vld [vmem:[#allocation2 + $0x48] sm:$0xff]  ;;  %v349_v10 = vld [vmem:[#allocation2 + $0x70] sm:$0xff] }
  0x44   : > { %972 = vmatpush3.bf16.msra.mxu0 %v1074_v19  ;;  %1009 = vmatpush3.bf16.msra.mxu1 %v1074_v19  ;;  %v351_v4 = vld [vmem:[#allocation2 + $0x28] sm:$0xff] }
  0x45   : > { %973 = vmatprep.subr.bf16.mxu0 %v1075_v20  ;;  %1002 = vmatprep.subr.bf16.mxu1 %v1075_v20  ;;  %v341_v9 = vld [vmem:[#allocation2 + $0x68] sm:$0xff] }
  0x48   : > { %974 = vmatpush3.bf16.msra.mxu0 %v1075_v20  ;;  %1010 = vmatpush3.bf16.msra.mxu1 %v1075_v20 }
  0x49   : > { %975 = vmatprep.subr.bf16.mxu0 %v1076_v23  ;;  %1003 = vmatprep.subr.bf16.mxu1 %v1076_v23 }
  0x4c   : > { %976 = vmatpush3.bf16.msra.mxu0 %v1076_v23  ;;  %1011 = vmatpush3.bf16.msra.mxu1 %v1076_v23 }
  0x4d   : > { %977 = vmatprep.subr.bf16.mxu0 %v1077_v24  ;;  %1004 = vmatprep.subr.bf16.mxu1 %v1077_v24 }
  0x50   : > { %978 = vmatpush3.bf16.msra.mxu0 %v1077_v24  ;;  %1012 = vmatpush3.bf16.msra.mxu1 %v1077_v24 }
  0x51   : > { %979 = vmatprep.subr.bf16.mxu0 %v1078_v25  ;;  %1005 = vmatprep.subr.bf16.mxu1 %v1078_v25 }
  0x54   : > { %980 = vmatpush3.bf16.msra.mxu0 %v1078_v25  ;;  %1013 = vmatpush3.bf16.msra.mxu1 %v1078_v25 }
  0x55   : > { %981 = vmatprep.subr.bf16.mxu0 %v1079_v26  ;;  %1006 = vmatprep.subr.bf16.mxu1 %v1079_v26 }
  0x58   : > { %982 = vmatpush3.bf16.msra.mxu0 %v1079_v26  ;;  %1014 = vmatpush3.bf16.msra.mxu1 %v1079_v26 }
  0x5b   : > { %984 = vmatmul.mubr.bf16.vlgmr.msra.gmra.mxu0 %v1082_v27  ;;  %992 = vmatmul.mubr.bf16.vlgmr.msra.gmra.mxu1 %v1083_v28 }
  0x5c   : > { %987 = vmatprep.mubr.bf16.mxu0 %v1084_v29  ;;  %995 = vmatprep.mubr.bf16.mxu1 %v1085_v30 }
  0x63   : > { %988 = vmatmul.mubr.bf16.gmra.mxu0 %v1086_v31  ;;  %996 = vmatmul.mubr.bf16.gmra.mxu1 %v1087_v32 }
 0x11b   : > { %v985_v35 = vpop.f32.mrf.mxu0  ;;  %v993_v36 = vpop.f32.mrf.mxu1 }
 0x11c   : > { %v579_v39 = vadd.f32 %v985_v35, %v338_v33  ;;  %v587_v40 = vadd.f32 %v993_v36, %v346_v34 }
 0x11d   : > { %v514_v41 = vpop.f32.mrf.mxu0  ;;  %v546_v42 = vpop.f32.mrf.mxu1 }
 0x11e   : > { %595 = vst [vmem:[#allocation2 + $0x58] sm:$0xff] %v579_v39  ;;  %603 = vst [vmem:[#allocation2 + $0x10] sm:$0xff] %v587_v40  ;;  %v577_v45 = vadd.f32 %v514_v41, %v336_v37  ;;  %v585_v46 = vadd.f32 %v546_v42, %v344_v38 }
 0x11f   : > { %v986_v47 = vpop.f32.mrf.mxu0  ;;  %v994_v48 = vpop.f32.mrf.mxu1 }
 0x120   : > { %593 = vst [vmem:[#allocation2 + $0x30] sm:$0xff] %v577_v45  ;;  %601 = vst [vmem:[#allocation2 + $0x40] sm:$0xff] %v585_v46  ;;  %v580_v51 = vadd.f32 %v986_v47, %v339_v43  ;;  %v588_v52 = vadd.f32 %v994_v48, %v347_v44 }
 0x121   : > { %v517_v53 = vpop.f32.mrf.mxu0  ;;  %v549_v54 = vpop.f32.mrf.mxu1 }
 0x122   : > { %596 = vst [vmem:[#allocation2 + $0x18] sm:$0xff] %v580_v51  ;;  %604 = vst [vmem:[#allocation2 + $0x38] sm:$0xff] %v588_v52  ;;  %v578_v57 = vadd.f32 %v517_v53, %v337_v49  ;;  %v586_v58 = vadd.f32 %v549_v54, %v345_v50 }
 0x123   : > { %v989_v59 = vpop.f32.mrf.mxu0  ;;  %v997_v60 = vpop.f32.mrf.mxu1 }
 0x124   : > { %594 = vst [vmem:[#allocation2] sm:$0xff] %v578_v57  ;;  %602 = vst [vmem:[#allocation2 + $0x20] sm:$0xff] %v586_v58  ;;  %v583_v63 = vadd.f32 %v989_v59, %v342_v55  ;;  %v591_v0 = vadd.f32 %v997_v60, %v350_v56 }
 0x125   : > { %v530_v1 = vpop.f32.mrf.mxu0  ;;  %v562_v2 = vpop.f32.mrf.mxu1 }
 0x126   : > { %599 = vst [vmem:[#allocation2 + $0x8] sm:$0xff] %v583_v63  ;;  %607 = vst [vmem:[#allocation2 + $0x78] sm:$0xff] %v591_v0  ;;  %v581_v5 = vadd.f32 %v530_v1, %v340_v61  ;;  %v589_v6 = vadd.f32 %v562_v2, %v348_v62 }
 0x127   : > { %v990_v7 = vpop.f32.mrf.mxu0  ;;  %v998_v8 = vpop.f32.mrf.mxu1 }
 0x128   : > { %597 = vst [vmem:[#allocation2 + $0x50] sm:$0xff] %v581_v5  ;;  %605 = vst [vmem:[#allocation2 + $0x60] sm:$0xff] %v589_v6  ;;  %v584_v11 = vadd.f32 %v990_v7, %v343_v3  ;;  %v592_v12 = vadd.f32 %v998_v8, %v351_v4  ;;  %612 = sbr.rel (%p867_p13) target bundleno = 317 (0x13d), region = 81 }
 0x129   : > { %v533_v13 = vpop.f32.mrf.mxu0  ;;  %v565_v14 = vpop.f32.mrf.mxu1 }
 0x12a   : > { %600 = vst [vmem:[#allocation2 + $0x48] sm:$0xff] %v584_v11  ;;  %608 = vst [vmem:[#allocation2 + $0x28] sm:$0xff] %v592_v12  ;;  %v582_v15 = vadd.f32 %v533_v13, %v341_v9  ;;  %v590_v16 = vadd.f32 %v565_v14, %v349_v10 }
 0x12c   : > { %598 = vst [vmem:[#allocation2 + $0x68] sm:$0xff] %v582_v15  ;;  %606 = vst [vmem:[#allocation2 + $0x70] sm:$0xff] %v590_v16 }
 0x12d   : > { %v613_v17 = vld [vmem:[#allocation2 + $0x30] sm:$0xff]  ;;  %v614_v18 = vld [vmem:[#allocation2] sm:$0xff]  ;;  %v615_v22 = vld [vmem:[#allocation2 + $0x58] sm:$0xff] }
 0x12e   : > { %v868_v19 = vld [vmem:[%s1312_s2] ss:$0 sm:$0xff]  ;;  %v616_v23 = vld [vmem:[#allocation2 + $0x18] sm:$0xff]  ;;  %v619_v29 = vld [vmem:[#allocation2 + $0x8] sm:$0xff] }
 0x12f   : > { %v636_v20 = vadd.f32 %v868_v19, %v613_v17  ;;  %v637_v21 = vadd.f32 %v868_v19, %v614_v18  ;;  %v617_v24 = vld [vmem:[#allocation2 + $0x50] sm:$0xff]  ;;  %v638_v25 = vadd.f32 %v868_v19, %v615_v22  ;;  %v639_v26 = vadd.f32 %v868_v19, %v616_v23  ;;  %v621_v35 = vld [vmem:[#allocation2 + $0x40] sm:$0xff]  ;;  %v624_v42 = vld [vmem:[#allocation2 + $0x38] sm:$0xff] }
 0x130   : > { %v640_v28 = vadd.f32 %v868_v19, %v617_v24  ;;  %v642_v34 = vadd.f32 %v868_v19, %v619_v29  ;;  %v622_v36 = vld [vmem:[#allocation2 + $0x20] sm:$0xff]  ;;  %v623_v37 = vld [vmem:[#allocation2 + $0x10] sm:$0xff]  ;;  %v644_v47 = vadd.f32 %v868_v19, %v621_v35  ;;  %v627_v53 = vld [vmem:[#allocation2 + $0x78] sm:$0xff]  ;;  %v647_v57 = vadd.f32 %v868_v19, %v624_v42 }
 0x131   : > { %v620_v30 = vld [vmem:[#allocation2 + $0x48] sm:$0xff]  ;;  %v652_v31 = vmax.f32 %v636_v20, 0.0  ;;  %v653_v32 = vmax.f32 %v637_v21, 0.0  ;;  %v654_v38 = vmax.f32 %v638_v25, 0.0  ;;  %v655_v39 = vmax.f32 %v639_v26, 0.0  ;;  %v625_v43 = vld [vmem:[#allocation2 + $0x60] sm:$0xff] }
 0x132   : > { %v656_v40 = vmax.f32 %v640_v28, 0.0  ;;  %v643_v41 = vadd.f32 %v868_v19, %v620_v30  ;;  %v658_v46 = vmax.f32 %v642_v34, 0.0  ;;  %v645_v51 = vadd.f32 %v868_v19, %v622_v36  ;;  %v628_v54 = vld [vmem:[#allocation2 + $0x28] sm:$0xff] }
 0x133   : > { %v618_v27 = vld [vmem:[#allocation2 + $0x68] sm:$0xff]  ;;  %v907_v44 = vpack.c.bf16 %v653_v32, %v652_v31  ;;  %v626_v48 = vld [vmem:[#allocation2 + $0x70] sm:$0xff]  ;;  %v912_v49 = vpack.c.bf16 %v655_v39, %v654_v38  ;;  %v646_v52 = vadd.f32 %v868_v19, %v623_v37  ;;  %v660_v56 = vmax.f32 %v644_v47, 0.0 }
 0x134   : > { %v641_v33 = vadd.f32 %v868_v19, %v618_v27  ;;  %v659_v50 = vmax.f32 %v643_v41, 0.0  ;;  %v648_v58 = vadd.f32 %v868_v19, %v625_v43  ;;  %v661_v60 = vmax.f32 %v645_v51, 0.0 }
 0x135   : > { %908 = vst [vmem:[%s1256_s29] sm:$0xff] %v907_v44   ;;  %944 = vst [vmem:[%s1256_s29 + $0x8] sm:$0xff] %v912_v49   ;;  %v662_v61 = vmax.f32 %v646_v52, 0.0  ;;  %v649_v62 = vadd.f32 %v868_v19, %v626_v48  ;;  %v663_v63 = vmax.f32 %v647_v57, 0.0  ;;  %v650_v1 = vadd.f32 %v868_v19, %v627_v53 }
 0x136   : > { %v657_v45 = vmax.f32 %v641_v33, 0.0  ;;  %v922_v59 = vpack.c.bf16 %v659_v50, %v658_v46  ;;  %v664_v0 = vmax.f32 %v648_v58, 0.0  ;;  %v651_v2 = vadd.f32 %v868_v19, %v628_v54 }
 0x137   : > { %v927_v3 = vpack.c.bf16 %v661_v60, %v660_v56  ;;  %v665_v4 = vmax.f32 %v649_v62, 0.0  ;;  %v932_v5 = vpack.c.bf16 %v663_v63, %v662_v61  ;;  %v666_v6 = vmax.f32 %v650_v1, 0.0 }
 0x138   : > { %v917_v55 = vpack.c.bf16 %v657_v45, %v656_v40  ;;  %946 = vst [vmem:[%s1256_s29 + $0x18] sm:$0xff] %v922_v59   ;;  %v667_v7 = vmax.f32 %v651_v2, 0.0 }
 0x139   : > { %947 = vst [vmem:[%s1256_s29 + $0x20] sm:$0xff] %v927_v3   ;;  %v937_v8 = vpack.c.bf16 %v665_v4, %v664_v0  ;;  %948 = vst [vmem:[%s1256_s29 + $0x28] sm:$0xff] %v932_v5  }
 0x13a   : > { %945 = vst [vmem:[%s1256_s29 + $0x10] sm:$0xff] %v917_v55   ;;  %v942_v9 = vpack.c.bf16 %v667_v7, %v666_v6 }
 0x13b   : > { %949 = vst [vmem:[%s1256_s29 + $0x30] sm:$0xff] %v937_v8  }
 0x13c   : > { %950 = vst [vmem:[%s1256_s29 + $0x38] sm:$0xff] %v942_v9  }
 0x13d PF: > { %s13_s18 = sadd.s32 1, %s1142_s18   ;;  %s1314_s12 = smov %s1122_s13 }
 0x13e   : > { %p10_p0 = scmp.ge.s32.totalorder %s13_s18, 6   ;;  %s1315_s13 = smov %s1216_s25 }
 0x13f   : > { %s1316_s14 = smov %s1134_s16  ;;  %s1317_s15 = smov %s1138_s17 }
 0x140   : > { %s1318_s16 = smov %s1321_s19  ;;  %s1319_s17 = smov %s1325_s20 }
 0x141   :  { %12 = sbr.rel (!%p10_p0) target bundleno = 4 (0x4), region = 119 }

// kernel: gcn_forward.11
= control target key start
LH: loop header
LB: loop body
LE: loop exit
PB: predicated region body
PF: predicated region fallthrough
CT: control target
= control target key end

     0   :  { %s1343_s18 = smov 0   ;;  %s1345_s19 = smov 0   ;;  %s1541_s0 = inlined_call_operand.vmem [shape: bf16[256,256], index: 0, kind: input, shape index: {}]   ;;  %s1542_s1 = inlined_call_operand.vmem [shape: bf16[256,128], index: 1, kind: input, shape index: {}]   ;;  %s1543_s2 = inlined_call_operand.vmem [shape: f32[1,128], index: 2, kind: input, shape index: {}]   ;;  %s1544_s3 = inlined_call_operand.vmem [shape: bf16[128,128], index: 3, kind: input, shape index: {}]   ;;  %s1545_s4 = inlined_call_operand.vmem [shape: f32[1,128], index: 4, kind: input, shape index: {}]   ;;  %s1546_s5 = inlined_call_operand.vmem [shape: f32[256,128], index: 5, kind: output, shape index: {}]  }
   0x1   :  { %s1347_s20 = smov 0   ;;  %s1349_s21 = smov 0  }
   0x2   :  { %s1351_s22 = smov 0   ;;  %s1353_s23 = smov 0  }
   0x3   :  { %s1355_s24 = smov 0  }
   0x4 LB: > { %s24_s25 = sadd.s32 1, %s1302_s22  ;;  %s27_s26 = sadd.s32 1, %s1306_s23  ;;  %s1310_s24 = sphi %s1355_s24, %s15_s24   ;;  %s1306_s23 = sphi %s1353_s23, %s1552_s23   ;;  %s1302_s22 = sphi %s1351_s22, %s1551_s22   ;;  %s1298_s21 = sphi %s1349_s21, %s1550_s21   ;;  %s1294_s20 = sphi %s1347_s20, %s1549_s20   ;;  %s1290_s19 = sphi %s1345_s19, %s1548_s19   ;;  %s1286_s18 = sphi %s1343_s18, %s1547_s18  }
   0x5   : > { %p25_p0 = scmp.ge.s32.totalorder %s24_s25, 2  ;;  %p43_p1 = scmp.ne.s32.totalorder %s1290_s19, %s1286_s18 }
   0x6   : > { %p44_p2 = scmp.eq.s32.totalorder %s1310_s24, 0  ;;  %s36_s30 = sadd.s32 1, %s1290_s19 }
   0x7   : > { %s1554_s25 = smov (%p25_p0, %s24_s25), 0  ;;  %s1556_s26 = smov (!%p25_p0, %s27_s26), %s1306_s23 }
   0x8   : > { %p45_p3 = por %p44_p2, %p43_p1  ;;  %p29_p4 = scmp.ge.s32.totalorder %s1556_s26, 2 }
   0x9   : > { %s32_s27 = ssub.s32 %s1302_s22, %s1554_s25  ;;  %p1005_p6 = scmp.ge.s32.totalorder %s1310_s24, 4 }
   0xa   : > { %s1558_s26 = smov (%p29_p4, %s1556_s26), 0 }
   0xb   : > { %s31_s28 = ssub.s32 %s1306_s23, %s1558_s26  ;;  %193 = sbr.rel (%p1005_p6) target bundleno = 32 (0x20), region = 28 }
   0xc   : > { %s33_s29 = sor.u32 %s32_s27, %s31_s28 }
   0xd   : > { %p34_p5 = scmp.eq.s32.totalorder %s33_s29, 0 }
   0xf   : > { %s1394_s6 = scalar_select %p34_p5, %s1290_s19, %s36_s30  }
  0x10   : > { %196 = sbr.rel (!%p45_p3) target bundleno = 32 (0x20), region = 32  ;;  %s198_s7 = sand.u32 (%p45_p3), 1, %s1290_s19  }
  0x11   : > { %s1046_s8 = sshll.u32 (%p45_p3), %s1306_s23, 5  ;;  %s1006_s9 = sshll.u32 (%p45_p3), %s198_s7, 6 }
  0x12   : > { %s203_s10 = sadd.s32 (%p45_p3), %s1302_s22, %s1046_s8  ;;  %s200_s15 = scalar_lea.vmem (%p45_p3), [#allocation3], %s1006_s9 }
  0x13   : > { %s1009_s11 = sshll.u32 (%p45_p3), %s203_s10, 2 }
  0x14   : > { %s1403_s14 = scalar_lea.vmem (%p45_p3), %s1541_s0, %s1009_s11 }
  0x15   : > { %v222_v0 = vld [vmem:[%s1403_s14] sm:$0xf]  ;;  %v224_v1 = vld [vmem:[%s1403_s14 + $0x8] sm:$0xf]  ;;  %v226_v2 = vld [vmem:[%s1403_s14 + $0x10] sm:$0xf] }
  0x16   : > { %223 = vst [vmem:[%s200_s15] sm:$0xf] %v222_v0  ;;  %225 = vst [vmem:[%s200_s15 + $0x4] sm:$0xf] %v224_v1  ;;  %v228_v3 = vld [vmem:[%s1403_s14 + $0x18] sm:$0xf] }
  0x17   : > { %227 = vst [vmem:[%s200_s15 + $0x8] sm:$0xf] %v226_v2  ;;  %v230_v4 = vld [vmem:[%s1403_s14 + $0x20] sm:$0xf]  ;;  %v232_v5 = vld [vmem:[%s1403_s14 + $0x28] sm:$0xf] }
  0x18   : > { %229 = vst [vmem:[%s200_s15 + $0xc] sm:$0xf] %v228_v3  ;;  %231 = vst [vmem:[%s200_s15 + $0x10] sm:$0xf] %v230_v4  ;;  %v234_v6 = vld [vmem:[%s1403_s14 + $0x30] sm:$0xf] }
  0x19   : > { %233 = vst [vmem:[%s200_s15 + $0x14] sm:$0xf] %v232_v5  ;;  %v236_v7 = vld [vmem:[%s1403_s14 + $0x38] sm:$0xf]  ;;  %v238_v8 = vld [vmem:[%s1403_s14 + $0x40] sm:$0xf] }
  0x1a   : > { %235 = vst [vmem:[%s200_s15 + $0x18] sm:$0xf] %v234_v6  ;;  %237 = vst [vmem:[%s200_s15 + $0x1c] sm:$0xf] %v236_v7  ;;  %v240_v9 = vld [vmem:[%s1403_s14 + $0x48] sm:$0xf] }
  0x1b   : > { %239 = vst [vmem:[%s200_s15 + $0x20] sm:$0xf] %v238_v8  ;;  %v242_v10 = vld [vmem:[%s1403_s14 + $0x50] sm:$0xf]  ;;  %v244_v11 = vld [vmem:[%s1403_s14 + $0x58] sm:$0xf] }
  0x1c   : > { %241 = vst [vmem:[%s200_s15 + $0x24] sm:$0xf] %v240_v9  ;;  %243 = vst [vmem:[%s200_s15 + $0x28] sm:$0xf] %v242_v10  ;;  %v246_v12 = vld [vmem:[%s1403_s14 + $0x60] sm:$0xf] }
  0x1d   : > { %245 = vst [vmem:[%s200_s15 + $0x2c] sm:$0xf] %v244_v11  ;;  %v248_v13 = vld [vmem:[%s1403_s14 + $0x68] sm:$0xf]  ;;  %v250_v14 = vld [vmem:[%s1403_s14 + $0x70] sm:$0xf] }
  0x1e   : > { %247 = vst [vmem:[%s200_s15 + $0x30] sm:$0xf] %v246_v12  ;;  %249 = vst [vmem:[%s200_s15 + $0x34] sm:$0xf] %v248_v13  ;;  %v252_v15 = vld [vmem:[%s1403_s14 + $0x78] sm:$0xf] }
  0x1f   : > { %251 = vst [vmem:[%s200_s15 + $0x38] sm:$0xf] %v250_v14  ;;  %253 = vst [vmem:[%s200_s15 + $0x3c] sm:$0xf] %v252_v15 }
  0x20 PF: > { %p1010_p7 = scmp.ge.s32.totalorder %s1310_s24, 1  ;;  %p317_p8 = scmp.lt.s32.totalorder %s1310_s24, 5 }
  0x22   : > { %p318_p9 = pnand %p1010_p7, %p317_p8 }
  0x23   : > { %s324_s16 = sand.u32 (!%p318_p9), 1, %s1286_s18   ;;  %s1012_s17 = sshll.u32 (!%p318_p9), %s1294_s20, 4 }
  0x24   : > { %321 = sbr.rel (%p318_p9) target bundleno = 544 (0x220), region = 77  ;;  %s1011_s27 = sshll.u32 (!%p318_p9), %s324_s16, 6 }
  0x25   : > { %p358_p10 = scmp.lt.s32.totalorder (!%p318_p9), %s1012_s17, 31  ;;  %s1014_s28 = sshll.u32 (!%p318_p9), %s1298_s21, 4 }
  0x26   : > { %p364_p11 = scmp.lt.s32.totalorder (!%p318_p9), %s1014_s28, 31  ;;  %s1436_s18 = scalar_lea.vmem (!%p318_p9), [#allocation3], %s1011_s27 }
  0x27   : > { %p1016_p12 = scmp.ne.s32.totalorder (!%p318_p9), %s1294_s20, 0 }
  0x29   : > { %s1560_s17 = smov (!%p358_p10, %s1012_s17), 31  ;;  %s1562_s28 = smov (!%p364_p11, %s1014_s28), 31 }
  0x2a   : > { %s1013_s29 = sshll.u32 %s1560_s17, 2  ;;  %s1015_s9 = sshll.u32 %s1562_s28, 3 }
  0x2b   : > { %s1429_s8 = scalar_lea.vmem %s1542_s1, %s1013_s29  ;;  %s1434_s12 = scalar_lea.vmem %s1546_s5, %s1015_s9 }
  0x2c   : > { %373 = sbr.rel (%p1016_p12) target bundleno = 58 (0x3a), region = 85 }
  0x31   : > { %v1312_v16 = vmov 0.0  }
  0x32   : > { %374 = vst [vmem:[#allocation2 + $0x30] sm:$0xff] %v1312_v16  ;;  %375 = vst [vmem:[#allocation2] sm:$0xff] %v1312_v16 }
  0x33   : > { %376 = vst [vmem:[#allocation2 + $0x58] sm:$0xff] %v1312_v16  ;;  %377 = vst [vmem:[#allocation2 + $0x18] sm:$0xff] %v1312_v16 }
  0x34   : > { %378 = vst [vmem:[#allocation2 + $0x50] sm:$0xff] %v1312_v16  ;;  %379 = vst [vmem:[#allocation2 + $0x68] sm:$0xff] %v1312_v16 }
  0x35   : > { %380 = vst [vmem:[#allocation2 + $0x8] sm:$0xff] %v1312_v16  ;;  %381 = vst [vmem:[#allocation2 + $0x48] sm:$0xff] %v1312_v16 }
  0x36   : > { %382 = vst [vmem:[#allocation2 + $0x40] sm:$0xff] %v1312_v16  ;;  %383 = vst [vmem:[#allocation2 + $0x20] sm:$0xff] %v1312_v16 }
  0x37   : > { %384 = vst [vmem:[#allocation2 + $0x10] sm:$0xff] %v1312_v16  ;;  %385 = vst [vmem:[#allocation2 + $0x38] sm:$0xff] %v1312_v16 }
  0x38   : > { %386 = vst [vmem:[#allocation2 + $0x60] sm:$0xff] %v1312_v16  ;;  %387 = vst [vmem:[#allocation2 + $0x70] sm:$0xff] %v1312_v16 }
  0x39   : > { %388 = vst [vmem:[#allocation2 + $0x78] sm:$0xff] %v1312_v16  ;;  %389 = vst [vmem:[#allocation2 + $0x28] sm:$0xff] %v1312_v16 }
  0x3a PF: > { %v1232_v17 = vld [vmem:[%s1429_s8 + $0x38] sm:$0xff]   ;;  %v1233_v18 = vld [vmem:[%s1429_s8 + $0x30] sm:$0xff]   ;;  %v1234_v19 = vld [vmem:[%s1429_s8 + $0x28] sm:$0xff]   ;;  %p1033_p13 = scmp.ne.s32.totalorder %s1294_s20, 1 }
  0x3b   : > { %1079 = vmatprep.subr.bf16.mxu0 %v1232_v17  ;;  %1143 = vmatprep.subr.bf16.mxu1 %v1232_v17  ;;  %v1235_v20 = vld [vmem:[%s1429_s8 + $0x20] sm:$0xff]   ;;  %v1236_v23 = vld [vmem:[%s1429_s8 + $0x18] sm:$0xff]   ;;  %v1237_v24 = vld [vmem:[%s1429_s8 + $0x10] sm:$0xff]  }
  0x3c   : > { %1080 = vmatpush3.bf16.msra.mxu0 %v1232_v17  ;;  %1151 = vmatpush3.bf16.msra.mxu1 %v1232_v17  ;;  %v1240_v21 = vld [vmem:[%s1436_s18] sm:$0xff]   ;;  %v1238_v25 = vld [vmem:[%s1429_s8 + $0x8] sm:$0xff]   ;;  %v1244_v29 = vld [vmem:[%s1436_s18 + $0x10] sm:$0xff]  }
  0x3d   : > { %1081 = vmatprep.subr.bf16.mxu0 %v1233_v18  ;;  %1144 = vmatprep.subr.bf16.mxu1 %v1233_v18  ;;  %v1241_v22 = vld [vmem:[%s1436_s18 + $0x20] sm:$0xff]   ;;  %v1242_v27 = vld [vmem:[%s1436_s18 + $0x8] sm:$0xff]   ;;  %v1245_v30 = vld [vmem:[%s1436_s18 + $0x30] sm:$0xff]  }
  0x3e   : > { %1095 = vmatprep.mubr.bf16.mxu0 %v1240_v21  ;;  %1103 = vmatprep.mubr.bf16.mxu1 %v1241_v22  ;;  %v1239_v26 = vld [vmem:[%s1429_s8] sm:$0xff]   ;;  %v1243_v28 = vld [vmem:[%s1436_s18 + $0x28] sm:$0xff]   ;;  %v1246_v31 = vld [vmem:[%s1436_s18 + $0x18] sm:$0xff]  }
  0x3f   : > { %v1247_v32 = vld [vmem:[%s1436_s18 + $0x38] sm:$0xff]   ;;  %v400_v34 = vld [vmem:[#allocation2 + $0x10] sm:$0xff]  ;;  %v398_v38 = vld [vmem:[#allocation2 + $0x40] sm:$0xff] }
  0x40   : > { %1082 = vmatpush3.bf16.msra.mxu0 %v1233_v18  ;;  %1152 = vmatpush3.bf16.msra.mxu1 %v1233_v18  ;;  %v392_v33 = vld [vmem:[#allocation2 + $0x58] sm:$0xff]  ;;  %v390_v37 = vld [vmem:[#allocation2 + $0x30] sm:$0xff]  ;;  %v391_v49 = vld [vmem:[#allocation2] sm:$0xff] }
  0x41   : > { %1083 = vmatprep.subr.bf16.mxu0 %v1234_v19  ;;  %1145 = vmatprep.subr.bf16.mxu1 %v1234_v19  ;;  %v393_v43 = vld [vmem:[#allocation2 + $0x18] sm:$0xff]  ;;  %v399_v50 = vld [vmem:[#allocation2 + $0x20] sm:$0xff]  ;;  %v396_v55 = vld [vmem:[#allocation2 + $0x8] sm:$0xff] }
  0x42   : > { %v401_v44 = vld [vmem:[#allocation2 + $0x38] sm:$0xff]  ;;  %v394_v61 = vld [vmem:[#allocation2 + $0x50] sm:$0xff]  ;;  %v402_v62 = vld [vmem:[#allocation2 + $0x60] sm:$0xff] }
  0x43   : > { %v404_v56 = vld [vmem:[#allocation2 + $0x78] sm:$0xff]  ;;  %v397_v3 = vld [vmem:[#allocation2 + $0x48] sm:$0xff]  ;;  %v403_v10 = vld [vmem:[#allocation2 + $0x70] sm:$0xff] }
  0x44   : > { %1084 = vmatpush3.bf16.msra.mxu0 %v1234_v19  ;;  %1153 = vmatpush3.bf16.msra.mxu1 %v1234_v19  ;;  %v405_v4 = vld [vmem:[#allocation2 + $0x28] sm:$0xff] }
  0x45   : > { %1085 = vmatprep.subr.bf16.mxu0 %v1235_v20  ;;  %1146 = vmatprep.subr.bf16.mxu1 %v1235_v20  ;;  %v395_v9 = vld [vmem:[#allocation2 + $0x68] sm:$0xff] }
  0x48   : > { %1086 = vmatpush3.bf16.msra.mxu0 %v1235_v20  ;;  %1154 = vmatpush3.bf16.msra.mxu1 %v1235_v20 }
  0x49   : > { %1087 = vmatprep.subr.bf16.mxu0 %v1236_v23  ;;  %1147 = vmatprep.subr.bf16.mxu1 %v1236_v23 }
  0x4c   : > { %1088 = vmatpush3.bf16.msra.mxu0 %v1236_v23  ;;  %1155 = vmatpush3.bf16.msra.mxu1 %v1236_v23 }
  0x4d   : > { %1089 = vmatprep.subr.bf16.mxu0 %v1237_v24  ;;  %1148 = vmatprep.subr.bf16.mxu1 %v1237_v24 }
  0x50   : > { %1090 = vmatpush3.bf16.msra.mxu0 %v1237_v24  ;;  %1156 = vmatpush3.bf16.msra.mxu1 %v1237_v24 }
  0x51   : > { %1091 = vmatprep.subr.bf16.mxu0 %v1238_v25  ;;  %1149 = vmatprep.subr.bf16.mxu1 %v1238_v25 }
  0x54   : > { %1092 = vmatpush3.bf16.msra.mxu0 %v1238_v25  ;;  %1157 = vmatpush3.bf16.msra.mxu1 %v1238_v25 }
  0x55   : > { %1093 = vmatprep.subr.bf16.mxu0 %v1239_v26  ;;  %1150 = vmatprep.subr.bf16.mxu1 %v1239_v26 }
  0x58   : > { %1094 = vmatpush3.bf16.msra.mxu0 %v1239_v26  ;;  %1158 = vmatpush3.bf16.msra.mxu1 %v1239_v26 }
  0x5b   : > { %1096 = vmatmul.mubr.bf16.vlgmr.msra.gmra.mxu0 %v1242_v27  ;;  %1104 = vmatmul.mubr.bf16.vlgmr.msra.gmra.mxu1 %v1243_v28 }
  0x5c   : > { %1099 = vmatprep.mubr.bf16.mxu0 %v1244_v29  ;;  %1107 = vmatprep.mubr.bf16.mxu1 %v1245_v30 }
  0x63   : > { %1100 = vmatmul.mubr.bf16.gmra.mxu0 %v1246_v31  ;;  %1108 = vmatmul.mubr.bf16.gmra.mxu1 %v1247_v32 }
 0x11b   : > { %v1097_v35 = vpop.f32.mrf.mxu0  ;;  %v1105_v36 = vpop.f32.mrf.mxu1 }
 0x11c   : > { %v633_v39 = vadd.f32 %v1097_v35, %v392_v33  ;;  %v641_v40 = vadd.f32 %v1105_v36, %v400_v34 }
 0x11d   : > { %v568_v41 = vpop.f32.mrf.mxu0  ;;  %v600_v42 = vpop.f32.mrf.mxu1 }
 0x11e   : > { %649 = vst [vmem:[#allocation2 + $0x58] sm:$0xff] %v633_v39  ;;  %657 = vst [vmem:[#allocation2 + $0x10] sm:$0xff] %v641_v40  ;;  %v631_v45 = vadd.f32 %v568_v41, %v390_v37  ;;  %v639_v46 = vadd.f32 %v600_v42, %v398_v38 }
 0x11f   : > { %v1098_v47 = vpop.f32.mrf.mxu0  ;;  %v1106_v48 = vpop.f32.mrf.mxu1 }
 0x120   : > { %647 = vst [vmem:[#allocation2 + $0x30] sm:$0xff] %v631_v45  ;;  %655 = vst [vmem:[#allocation2 + $0x40] sm:$0xff] %v639_v46  ;;  %v634_v51 = vadd.f32 %v1098_v47, %v393_v43  ;;  %v642_v52 = vadd.f32 %v1106_v48, %v401_v44 }
 0x121   : > { %v571_v53 = vpop.f32.mrf.mxu0  ;;  %v603_v54 = vpop.f32.mrf.mxu1 }
 0x122   : > { %650 = vst [vmem:[#allocation2 + $0x18] sm:$0xff] %v634_v51  ;;  %658 = vst [vmem:[#allocation2 + $0x38] sm:$0xff] %v642_v52  ;;  %v632_v57 = vadd.f32 %v571_v53, %v391_v49  ;;  %v640_v58 = vadd.f32 %v603_v54, %v399_v50 }
 0x123   : > { %v1101_v59 = vpop.f32.mrf.mxu0  ;;  %v1109_v60 = vpop.f32.mrf.mxu1 }
 0x124   : > { %648 = vst [vmem:[#allocation2] sm:$0xff] %v632_v57  ;;  %656 = vst [vmem:[#allocation2 + $0x20] sm:$0xff] %v640_v58  ;;  %v637_v63 = vadd.f32 %v1101_v59, %v396_v55  ;;  %v645_v0 = vadd.f32 %v1109_v60, %v404_v56 }
 0x125   : > { %v584_v1 = vpop.f32.mrf.mxu0  ;;  %v616_v2 = vpop.f32.mrf.mxu1 }
 0x126   : > { %653 = vst [vmem:[#allocation2 + $0x8] sm:$0xff] %v637_v63  ;;  %661 = vst [vmem:[#allocation2 + $0x78] sm:$0xff] %v645_v0  ;;  %v635_v5 = vadd.f32 %v584_v1, %v394_v61  ;;  %v643_v6 = vadd.f32 %v616_v2, %v402_v62 }
 0x127   : > { %v1102_v7 = vpop.f32.mrf.mxu0  ;;  %v1110_v8 = vpop.f32.mrf.mxu1 }
 0x128   : > { %651 = vst [vmem:[#allocation2 + $0x50] sm:$0xff] %v635_v5  ;;  %659 = vst [vmem:[#allocation2 + $0x60] sm:$0xff] %v643_v6  ;;  %v638_v11 = vadd.f32 %v1102_v7, %v397_v3  ;;  %v646_v12 = vadd.f32 %v1110_v8, %v405_v4  ;;  %666 = sbr.rel (%p1033_p13) target bundleno = 544 (0x220), region = 89 }
 0x129   : > { %v587_v13 = vpop.f32.mrf.mxu0  ;;  %v619_v14 = vpop.f32.mrf.mxu1 }
 0x12a   : > { %654 = vst [vmem:[#allocation2 + $0x48] sm:$0xff] %v638_v11  ;;  %662 = vst [vmem:[#allocation2 + $0x28] sm:$0xff] %v646_v12  ;;  %v636_v15 = vadd.f32 %v587_v13, %v395_v9  ;;  %v644_v16 = vadd.f32 %v619_v14, %v403_v10 }
 0x12c   : > { %652 = vst [vmem:[#allocation2 + $0x68] sm:$0xff] %v636_v15  ;;  %660 = vst [vmem:[#allocation2 + $0x70] sm:$0xff] %v644_v16 }
 0x12d   : > { %v1248_v17 = vld [vmem:[%s1544_s3 + $0x38] sm:$0xff]   ;;  %v1249_v18 = vld [vmem:[%s1544_s3 + $0x30] sm:$0xff]   ;;  %v1250_v19 = vld [vmem:[%s1544_s3 + $0x28] sm:$0xff]  }
 0x12e   : > { %1111 = vmatprep.subr.bf16.mxu0 %v1248_v17  ;;  %1159 = vmatprep.subr.bf16.mxu1 %v1248_v17  ;;  %v1251_v20 = vld [vmem:[%s1544_s3 + $0x20] sm:$0xff]   ;;  %v667_v21 = vld [vmem:[#allocation2 + $0x30] sm:$0xff]  ;;  %v1252_v32 = vld [vmem:[%s1544_s3 + $0x18] sm:$0xff]  }
 0x12f   : > { %1112 = vmatpush3.bf16.msra.mxu0 %v1248_v17  ;;  %1167 = vmatpush3.bf16.msra.mxu1 %v1248_v17  ;;  %v668_v22 = vld [vmem:[#allocation2] sm:$0xff]  ;;  %v1253_v37 = vld [vmem:[%s1544_s3 + $0x10] sm:$0xff]   ;;  %v1254_v38 = vld [vmem:[%s1544_s3 + $0x8] sm:$0xff]  }
 0x130   : > { %1113 = vmatprep.subr.bf16.mxu0 %v1249_v18  ;;  %1160 = vmatprep.subr.bf16.mxu1 %v1249_v18  ;;  %v1471_v23 = vld [vmem:[%s1543_s2] ss:$0 sm:$0xff]  ;;  %v669_v39 = vld [vmem:[#allocation2 + $0x58] sm:$0xff]  ;;  %v677_v41 = vld [vmem:[#allocation2 + $0x10] sm:$0xff] }
 0x131   : > { %v690_v24 = vadd.f32 %v1471_v23, %v667_v21  ;;  %v691_v25 = vadd.f32 %v1471_v23, %v668_v22  ;;  %v675_v26 = vld [vmem:[#allocation2 + $0x40] sm:$0xff]  ;;  %v670_v40 = vld [vmem:[#allocation2 + $0x18] sm:$0xff]  ;;  %v671_v43 = vld [vmem:[#allocation2 + $0x50] sm:$0xff]  ;;  %v692_v47 = vadd.f32 %v1471_v23, %v669_v39  ;;  %v700_v49 = vadd.f32 %v1471_v23, %v677_v41 }
 0x132   : > { %v676_v27 = vld [vmem:[#allocation2 + $0x20] sm:$0xff]  ;;  %v698_v28 = vadd.f32 %v1471_v23, %v675_v26  ;;  %v678_v42 = vld [vmem:[#allocation2 + $0x38] sm:$0xff]  ;;  %v693_v48 = vadd.f32 %v1471_v23, %v670_v40  ;;  %v694_v51 = vadd.f32 %v1471_v23, %v671_v43  ;;  %v673_v60 = vld [vmem:[#allocation2 + $0x8] sm:$0xff] }
 0x133   : > { %1114 = vmatpush3.bf16.msra.mxu0 %v1249_v18  ;;  %1168 = vmatpush3.bf16.msra.mxu1 %v1249_v18  ;;  %v699_v29 = vadd.f32 %v1471_v23, %v676_v27  ;;  %v706_v30 = vmax.f32 %v690_v24, 0.0  ;;  %v707_v31 = vmax.f32 %v691_v25, 0.0  ;;  %v672_v44 = vld [vmem:[#allocation2 + $0x68] sm:$0xff]  ;;  %v679_v45 = vld [vmem:[#allocation2 + $0x60] sm:$0xff]  ;;  %v680_v46 = vld [vmem:[#allocation2 + $0x70] sm:$0xff]  ;;  %v701_v50 = vadd.f32 %v1471_v23, %v678_v42 }
 0x134   : > { %1115 = vmatprep.subr.bf16.mxu0 %v1250_v19  ;;  %1161 = vmatprep.subr.bf16.mxu1 %v1250_v19  ;;  %v714_v33 = vmax.f32 %v698_v28, 0.0  ;;  %v695_v52 = vadd.f32 %v1471_v23, %v672_v44  ;;  %v702_v53 = vadd.f32 %v1471_v23, %v679_v45  ;;  %v703_v54 = vadd.f32 %v1471_v23, %v680_v46  ;;  %v1255_v55 = vld [vmem:[%s1544_s3] sm:$0xff]   ;;  %v674_v61 = vld [vmem:[#allocation2 + $0x48] sm:$0xff]  ;;  %v681_v2 = vld [vmem:[#allocation2 + $0x78] sm:$0xff] }
 0x135   : > { %v715_v34 = vmax.f32 %v699_v29, 0.0  ;;  %v722_v35 = vpack.c.bf16 %v707_v31, %v706_v30  ;;  %v708_v56 = vmax.f32 %v692_v47, 0.0  ;;  %v709_v57 = vmax.f32 %v693_v48, 0.0  ;;  %v682_v3 = vld [vmem:[#allocation2 + $0x28] sm:$0xff]  ;;  %v1035_v18 = vld [vmem:[%s1545_s4] ss:$0 sm:$0xff] }
 0x136   : > { %v716_v58 = vmax.f32 %v700_v49, 0.0  ;;  %v717_v59 = vmax.f32 %v701_v50, 0.0  ;;  %v710_v62 = vmax.f32 %v694_v51, 0.0  ;;  %v711_v63 = vmax.f32 %v695_v52, 0.0 }
 0x137   : > { %1116 = vmatpush3.bf16.msra.mxu0 %v1250_v19  ;;  %1169 = vmatpush3.bf16.msra.mxu1 %v1250_v19  ;;  %v726_v36 = vpack.c.bf16 %v715_v34, %v714_v33  ;;  %v718_v0 = vmax.f32 %v702_v53, 0.0  ;;  %v719_v1 = vmax.f32 %v703_v54, 0.0  ;;  %v723_v4 = vpack.c.bf16 %v709_v57, %v708_v56 }
 0x138   : > { %1117 = vmatprep.subr.bf16.mxu0 %v1251_v20  ;;  %1162 = vmatprep.subr.bf16.mxu1 %v1251_v20  ;;  %v696_v5 = vadd.f32 %v1471_v23, %v673_v60  ;;  %v727_v6 = vpack.c.bf16 %v717_v59, %v716_v58  ;;  %v697_v7 = vadd.f32 %v1471_v23, %v674_v61 }
 0x139   : > { %1127 = vmatprep.mubr.bf16.mxu0 %v722_v35  ;;  %1135 = vmatprep.mubr.bf16.mxu1 %v726_v36  ;;  %v704_v8 = vadd.f32 %v1471_v23, %v681_v2  ;;  %v705_v9 = vadd.f32 %v1471_v23, %v682_v3  ;;  %v724_v10 = vpack.c.bf16 %v711_v63, %v710_v62 }
 0x13a   : > { %v728_v11 = vpack.c.bf16 %v719_v1, %v718_v0  ;;  %v712_v12 = vmax.f32 %v696_v5, 0.0  ;;  %v713_v13 = vmax.f32 %v697_v7, 0.0 }
 0x13b   : > { %1118 = vmatpush3.bf16.msra.mxu0 %v1251_v20  ;;  %1170 = vmatpush3.bf16.msra.mxu1 %v1251_v20  ;;  %v720_v14 = vmax.f32 %v704_v8, 0.0  ;;  %v721_v15 = vmax.f32 %v705_v9, 0.0 }
 0x13c   : > { %1119 = vmatprep.subr.bf16.mxu0 %v1252_v32  ;;  %1163 = vmatprep.subr.bf16.mxu1 %v1252_v32  ;;  %v725_v16 = vpack.c.bf16 %v713_v13, %v712_v12 }
 0x13d   : > { %v729_v17 = vpack.c.bf16 %v721_v15, %v720_v14 }
 0x13f   : > { %1120 = vmatpush3.bf16.msra.mxu0 %v1252_v32  ;;  %1171 = vmatpush3.bf16.msra.mxu1 %v1252_v32 }
 0x140   : > { %1121 = vmatprep.subr.bf16.mxu0 %v1253_v37  ;;  %1164 = vmatprep.subr.bf16.mxu1 %v1253_v37 }
 0x143   : > { %1122 = vmatpush3.bf16.msra.mxu0 %v1253_v37  ;;  %1172 = vmatpush3.bf16.msra.mxu1 %v1253_v37 }
 0x144   : > { %1123 = vmatprep.subr.bf16.mxu0 %v1254_v38  ;;  %1165 = vmatprep.subr.bf16.mxu1 %v1254_v38 }
 0x147   : > { %1124 = vmatpush3.bf16.msra.mxu0 %v1254_v38  ;;  %1173 = vmatpush3.bf16.msra.mxu1 %v1254_v38 }
 0x148   : > { %1125 = vmatprep.subr.bf16.mxu0 %v1255_v55  ;;  %1166 = vmatprep.subr.bf16.mxu1 %v1255_v55 }
 0x14b   : > { %1126 = vmatpush3.bf16.msra.mxu0 %v1255_v55  ;;  %1174 = vmatpush3.bf16.msra.mxu1 %v1255_v55 }
 0x14e   : > { %1128 = vmatmul.mubr.bf16.vlgmr.msra.gmra.mxu0 %v723_v4  ;;  %1136 = vmatmul.mubr.bf16.vlgmr.msra.gmra.mxu1 %v727_v6 }
 0x14f   : > { %1131 = vmatprep.mubr.bf16.mxu0 %v724_v10  ;;  %1139 = vmatprep.mubr.bf16.mxu1 %v728_v11 }
 0x156   : > { %1132 = vmatmul.mubr.bf16.gmra.mxu0 %v725_v16  ;;  %1140 = vmatmul.mubr.bf16.gmra.mxu1 %v729_v17 }
 0x20e   : > { %v1129_v19 = vpop.f32.mrf.mxu0  ;;  %v1137_v20 = vpop.f32.mrf.mxu1 }
 0x20f   : > { %v844_v21 = vadd.f32 %v1129_v19, %v1035_v18  ;;  %v876_v22 = vadd.f32 %v1137_v20, %v1035_v18 }
 0x210   : > { %v835_v23 = vpop.f32.mrf.mxu0  ;;  %v867_v24 = vpop.f32.mrf.mxu1 }
 0x211   : > { %900 = vst [vmem:[%s1434_s12 + $0x10] sm:$0xff] %v844_v21  ;;  %908 = vst [vmem:[%s1434_s12 + $0x50] sm:$0xff] %v876_v22  ;;  %v836_v25 = vadd.f32 %v1035_v18, %v835_v23  ;;  %v868_v26 = vadd.f32 %v1035_v18, %v867_v24 }
 0x212   : > { %v1130_v27 = vpop.f32.mrf.mxu0  ;;  %v1138_v28 = vpop.f32.mrf.mxu1 }
 0x213   : > { %898 = vst [vmem:[%s1434_s12] sm:$0xff] %v836_v25  ;;  %906 = vst [vmem:[%s1434_s12 + $0x40] sm:$0xff] %v868_v26  ;;  %v847_v29 = vadd.f32 %v1130_v27, %v1035_v18  ;;  %v879_v30 = vadd.f32 %v1138_v28, %v1035_v18 }
 0x214   : > { %v838_v31 = vpop.f32.mrf.mxu0  ;;  %v870_v32 = vpop.f32.mrf.mxu1 }
 0x215   : > { %901 = vst [vmem:[%s1434_s12 + $0x18] sm:$0xff] %v847_v29  ;;  %909 = vst [vmem:[%s1434_s12 + $0x58] sm:$0xff] %v879_v30  ;;  %v839_v33 = vadd.f32 %v1035_v18, %v838_v31  ;;  %v871_v34 = vadd.f32 %v1035_v18, %v870_v32 }
 0x216   : > { %v1133_v35 = vpop.f32.mrf.mxu0  ;;  %v1141_v36 = vpop.f32.mrf.mxu1 }
 0x217   : > { %899 = vst [vmem:[%s1434_s12 + $0x8] sm:$0xff] %v839_v33  ;;  %907 = vst [vmem:[%s1434_s12 + $0x48] sm:$0xff] %v871_v34  ;;  %v860_v37 = vadd.f32 %v1133_v35, %v1035_v18  ;;  %v892_v38 = vadd.f32 %v1141_v36, %v1035_v18 }
 0x218   : > { %v851_v39 = vpop.f32.mrf.mxu0  ;;  %v883_v40 = vpop.f32.mrf.mxu1 }
 0x219   : > { %904 = vst [vmem:[%s1434_s12 + $0x30] sm:$0xff] %v860_v37  ;;  %912 = vst [vmem:[%s1434_s12 + $0x70] sm:$0xff] %v892_v38  ;;  %v852_v41 = vadd.f32 %v1035_v18, %v851_v39  ;;  %v884_v42 = vadd.f32 %v1035_v18, %v883_v40 }
 0x21a   : > { %v1134_v43 = vpop.f32.mrf.mxu0  ;;  %v1142_v44 = vpop.f32.mrf.mxu1 }
 0x21b   : > { %902 = vst [vmem:[%s1434_s12 + $0x20] sm:$0xff] %v852_v41  ;;  %910 = vst [vmem:[%s1434_s12 + $0x60] sm:$0xff] %v884_v42  ;;  %v863_v45 = vadd.f32 %v1134_v43, %v1035_v18  ;;  %v895_v46 = vadd.f32 %v1142_v44, %v1035_v18 }
 0x21c   : > { %v854_v47 = vpop.f32.mrf.mxu0  ;;  %v886_v48 = vpop.f32.mrf.mxu1 }
 0x21d   : > { %905 = vst [vmem:[%s1434_s12 + $0x38] sm:$0xff] %v863_v45  ;;  %913 = vst [vmem:[%s1434_s12 + $0x78] sm:$0xff] %v895_v46  ;;  %v855_v49 = vadd.f32 %v1035_v18, %v854_v47  ;;  %v887_v50 = vadd.f32 %v1035_v18, %v886_v48 }
 0x21f   : > { %903 = vst [vmem:[%s1434_s12 + $0x28] sm:$0xff] %v855_v49  ;;  %911 = vst [vmem:[%s1434_s12 + $0x68] sm:$0xff] %v887_v50 }
 0x220 PF: > { %s15_s24 = sadd.s32 1, %s1310_s24   ;;  %s1547_s18 = smov %s1290_s19 }
 0x221   : > { %p12_p0 = scmp.ge.s32.totalorder %s15_s24, 6   ;;  %s1548_s19 = smov %s1394_s6 }
 0x222   : > { %s1549_s20 = smov %s1302_s22  ;;  %s1550_s21 = smov %s1306_s23 }
 0x223   : > { %s1551_s22 = smov %s1554_s25  ;;  %s1552_s23 = smov %s1558_s26 }
 0x224   :  { %14 = sbr.rel (!%p12_p0) target bundleno = 4 (0x4), region = 127 }

</bundles_post_ra>
